<compile_context>
chip_gen: v5e
topology: v5e:2x2
jax: 0.10.0
libtpu: 0.0.40
codegen_flags: <defaults>
</compile_context>

<pallas_src>
import functools

import numpy as np
import jax
import jax.numpy as jnp
from jax import lax
from jax.experimental import pallas as pl
from jax.experimental.pallas import tpu as pltpu


def _round_up(x, m):
    return (x + m - 1) // m * m


def _conv3x3_kernel(x_ref, w_ref, b_ref, o_ref, col_ref, *, TR, W, Cin, apply_relu):
    """One (batch, row-tile) step of a 3x3 stride-1 same-padding conv.

    x_ref:   (1, 1, TR+2, W+2, Cin)  bf16  haloed input row tile
    w_ref:   (9*Cin, Cout)           bf16  flattened HWIO weights: (ky*3+kx)*Cin+ci
    b_ref:   (1, Cout)               f32   bias
    o_ref:   (1, 1, TR*W, Cout)      bf16/f32 lane-dense output tile
    col_ref: (TR*W, 9*Cin)           bf16  im2col scratch (VMEM)
    """
    # Build the im2col tile once; a single K=9*Cin matmul then feeds the MXU,
    # keeping the f32 accumulation inside the MXU pipeline instead of nine
    # read-modify-write passes over a VMEM accumulator.
    for k in range(9):
        ky, kx = divmod(k, 3)
        col_ref[:, k * Cin:(k + 1) * Cin] = (
            x_ref[0, 0, ky:ky + TR, kx:kx + W, :].reshape(TR * W, Cin))

    acc = jnp.dot(col_ref[...], w_ref[...], preferred_element_type=jnp.float32)
    acc = acc + b_ref[...]                 # (TR*W, Cout) + (1, Cout)
    if apply_relu:
        acc = jnp.maximum(acc, 0.0)
    o_ref[0, 0] = acc.astype(o_ref.dtype)


def _pick_row_tile(H, W, cin, cout, budget_bytes=12 * 1024 * 1024):
    """Largest divisor of H whose per-step VMEM working set fits the budget."""
    best = 1
    for tr in range(1, H + 1):
        if H % tr:
            continue
        in_blk = (tr + 2) * (W + 2) * cin * 2       # bf16 input tile
        col_blk = tr * W * 9 * cin * 2              # bf16 im2col scratch
        out_blk = tr * W * cout * 4                 # worst-case f32 output tile
        w_blk = 9 * cin * cout * 2                  # bf16 weights
        total = 2 * in_blk + 2 * out_blk + col_blk + 2 * w_blk  # double-buffered
        if total <= budget_bytes:
            best = tr
    return best


def conv3x3_same(x_nhwc, w2d, bias, *, apply_relu, out_dtype, row_tile=None):
    """3x3 stride-1 same-padding conv.

    x_nhwc: (B, H, W, Cin); w2d: (9*Cin, Cout) with index (ky*3+kx)*Cin+ci;
    bias: (Cout,). Returns (B, H, W, Cout) in out_dtype.
    """
    B, H, W, Cin = x_nhwc.shape
    Cout = w2d.shape[-1]

    TR = row_tile if row_tile is not None else _pick_row_tile(H, W, Cin, Cout)
    assert H % TR == 0, (H, TR)
    nT = H // TR

    xb = x_nhwc.astype(jnp.bfloat16)
    # Spatial zero padding + overlapping (2-row halo) row tiles, built as XLA
    # glue so every grid step sees a contiguous (TR+2, W+2, Cin) block.
    x_pad = jnp.pad(xb, ((0, 0), (1, 1), (1, 1), (0, 0)))
    xt = jnp.stack([x_pad[:, i * TR:i * TR + TR + 2] for i in range(nT)], axis=1)
    # xt: (B, nT, TR+2, W+2, Cin)

    kernel = functools.partial(_conv3x3_kernel, TR=TR, W=W, Cin=Cin,
                               apply_relu=apply_relu)

    out = pl.pallas_call(
        kernel,
        out_shape=jax.ShapeDtypeStruct((B, nT, TR * W, Cout), out_dtype),
        grid_spec=pltpu.PrefetchScalarGridSpec(
            num_scalar_prefetch=0,
            grid=(B, nT),
            in_specs=[
                pl.BlockSpec((1, 1, TR + 2, W + 2, Cin),
                             lambda b, r: (b, r, 0, 0, 0)),
                pl.BlockSpec((9 * Cin, Cout), lambda b, r: (0, 0)),
                pl.BlockSpec((1, Cout), lambda b, r: (0, 0)),
            ],
            out_specs=pl.BlockSpec((1, 1, TR * W, Cout),
                                   lambda b, r: (b, r, 0, 0)),
            scratch_shapes=[pltpu.VMEM((TR * W, 9 * Cin), jnp.bfloat16)],
        ),
        compiler_params=pltpu.CompilerParams(
            dimension_semantics=("parallel", "parallel"),
            vmem_limit_bytes=32 * 1024 * 1024,
        ),
    )(xt, w2d.astype(jnp.bfloat16),
      bias.reshape(1, Cout).astype(jnp.float32))

    # (B, nT, TR*W, Cout) -> (B, H, W, Cout): pure metadata reshape.
    return out.reshape(B, H, W, Cout)


def _init_conv_params(key, cin, cout):
    """Deterministic Conv2d-style init; weights in HWIO (3,3,Cin,Cout), f32."""
    kw, kb = jax.random.split(key)
    bound = 1.0 / float(np.sqrt(cin * 9))
    w = jax.random.uniform(kw, (3, 3, cin, cout), jnp.float32, -bound, bound)
    b = jax.random.uniform(kb, (cout,), jnp.float32, -bound, bound)
    return w, b


class RegressionModelPallas:
    def __init__(self, num_features_in, num_anchors=9, feature_size=256, seed=0):
        keys = jax.random.split(jax.random.PRNGKey(seed), 5)
        self.num_anchors = num_anchors
        cins = [num_features_in] + [feature_size] * 4
        couts = [feature_size] * 4 + [num_anchors * 4]
        self.params = [_init_conv_params(k, ci, co)
                       for k, ci, co in zip(keys, cins, couts)]

    def __call__(self, x_nchw, row_tile=None):
        x = jnp.transpose(x_nchw, (0, 2, 3, 1)).astype(jnp.float32)  # NCHW->NHWC
        n_layers = len(self.params)
        for i, (w_hwio, b) in enumerate(self.params):
            cin, cout = w_hwio.shape[2], w_hwio.shape[3]
            w2d = w_hwio.reshape(9 * cin, cout)     # (ky*3+kx)*cin + ci ordering
            if i < n_layers - 1:
                x = conv3x3_same(x, w2d, b, apply_relu=True,
                                 out_dtype=jnp.bfloat16, row_tile=row_tile)
            else:
                # Lane-pad the 36-wide head to 128 so stores are lane-dense,
                # then slice back to num_anchors*4 before the final reshape.
                cpad = _round_up(cout, 128)
                w2d = jnp.pad(w2d, ((0, 0), (0, cpad - cout)))
                bp = jnp.pad(b, (0, cpad - cout))
                x = conv3x3_same(x, w2d, bp, apply_relu=False,
                                 out_dtype=jnp.float32, row_tile=row_tile)
                x = x[..., :cout]
        B = x.shape[0]
        # NHWC with C = num_anchors*4  ==  permute(0,2,3,1).view(B, -1, 4)
        return x.reshape(B, -1, 4)


def reference_forward(params, x_nchw):
    """Pure-JAX reference matching the kernels' bf16-storage / f32-accumulate."""
    x = jnp.transpose(x_nchw, (0, 2, 3, 1)).astype(jnp.float32)
    n = len(params)
    for i, (w_hwio, b) in enumerate(params):
        xi = x.astype(jnp.bfloat16).astype(jnp.float32)
        wi = w_hwio.astype(jnp.bfloat16).astype(jnp.float32)
        y = lax.conv_general_dilated(
            xi, wi, window_strides=(1, 1), padding="SAME",
            dimension_numbers=("NHWC", "HWIO", "NHWC"),
            precision=lax.Precision.HIGHEST)
        y = y + b[None, None, None, :]
        if i < n - 1:
            y = jnp.maximum(y, 0.0).astype(jnp.bfloat16).astype(jnp.float32)
        x = y
    B = x.shape[0]
    return x.reshape(B, -1, 4)


if __name__ == "__main__":
    B, Cin, H, W = 2, 4, 16, 16
    num_anchors = 9
    feature_size = 64  # small feature_size for a quick synthetic test

    key = jax.random.PRNGKey(0)
    x = jax.random.normal(key, (B, Cin, H, W), dtype=jnp.float32)

    model = RegressionModelPallas(Cin, num_anchors=num_anchors,
                                  feature_size=feature_size, seed=0)

    # row_tile=8 -> two row tiles per image: exercises the halo/tiling path.
    out = jax.block_until_ready(model(x, row_tile=8))
    assert out.shape == (B, H * W * num_anchors, 4), out.shape

    ref = jax.block_until_ready(reference_forward(model.params, x))
    max_err = float(jnp.max(jnp.abs(out - ref)))
    assert np.allclose(np.asarray(out), np.asarray(ref),
                       atol=5e-3, rtol=5e-3), f"max abs err = {max_err}"

    print("KERNEL_OK")
</pallas_src>

<mosaic_0001>
module attributes {stable_mosaic.version = 11 : i64} {
  func.func @_conv3x3_kernel(%arg0: i32, %arg1: i32, %arg2: memref<1x1x10x18x4xbf16, #tpu.memory_space<vmem>>, %arg3: memref<36x64xbf16, #tpu.memory_space<vmem>>, %arg4: memref<1x64xf32, #tpu.memory_space<vmem>>, %arg5: memref<1x1x128x64xbf16, #tpu.memory_space<vmem>>, %arg6: memref<128x36xbf16, #tpu.memory_space<vmem>>) attributes {dimension_semantics = [#tpu.dimension_semantics<parallel>, #tpu.dimension_semantics<parallel>], iteration_bounds = array<i64: 2, 2>, scalar_prefetch = 0 : i64, scratch_operands = 1 : i64, tpu.core_type = #tpu.core_type<tc>, window_params = [{transform_indices = @transform_0, window_bounds = array<i64: 1, 1, 10, 18, 4>}, {pipeline_mode = #tpu.pipeline_mode<synchronous>, transform_indices = @transform_1, window_bounds = array<i64: 36, 64>}, {pipeline_mode = #tpu.pipeline_mode<synchronous>, transform_indices = @transform_2, window_bounds = array<i64: 1, 64>}, {transform_indices = @transform_3, window_bounds = array<i64: 1, 1, 128, 64>}]} {
    %c0 = arith.constant 0 : index
    %c0_0 = arith.constant 0 : index
    %c0_1 = arith.constant 0 : index
    %c0_2 = arith.constant 0 : index
    %c0_3 = arith.constant 0 : index
    %0 = vector.load %arg2[%c0, %c0_0, %c0_1, %c0_2, %c0_3] : memref<1x1x10x18x4xbf16, #tpu.memory_space<vmem>>, vector<1x1x8x16x4xbf16>
    %1 = vector.shape_cast %0 : vector<1x1x8x16x4xbf16> to vector<8x16x4xbf16>
    %2 = vector.shape_cast %1 : vector<8x16x4xbf16> to vector<128x4xbf16>
    %c0_4 = arith.constant 0 : index
    %c0_5 = arith.constant 0 : index
    %3 = vector.load %arg6[%c0_4, %c0_5] : memref<128x36xbf16, #tpu.memory_space<vmem>>, vector<128x4xbf16>
    tpu.vector_store %arg6[%c0_4, %c0_5], %2 {strides = array<i32>} : memref<128x36xbf16, #tpu.memory_space<vmem>>, vector<128x4xbf16>,
    %c0_6 = arith.constant 0 : index
    %c0_7 = arith.constant 0 : index
    %c0_8 = arith.constant 0 : index
    %c1 = arith.constant 1 : index
    %c0_9 = arith.constant 0 : index
    %4 = vector.load %arg2[%c0_6, %c0_7, %c0_8, %c1, %c0_9] : memref<1x1x10x18x4xbf16, #tpu.memory_space<vmem>>, vector<1x1x8x16x4xbf16>
    %5 = vector.shape_cast %4 : vector<1x1x8x16x4xbf16> to vector<8x16x4xbf16>
    %6 = vector.shape_cast %5 : vector<8x16x4xbf16> to vector<128x4xbf16>
    %c0_10 = arith.constant 0 : index
    %c4 = arith.constant 4 : index
    %7 = vector.load %arg6[%c0_10, %c4] : memref<128x36xbf16, #tpu.memory_space<vmem>>, vector<128x4xbf16>
    tpu.vector_store %arg6[%c0_10, %c4], %6 {strides = array<i32>} : memref<128x36xbf16, #tpu.memory_space<vmem>>, vector<128x4xbf16>,
    %c0_11 = arith.constant 0 : index
    %c0_12 = arith.constant 0 : index
    %c0_13 = arith.constant 0 : index
    %c2 = arith.constant 2 : index
    %c0_14 = arith.constant 0 : index
    %8 = vector.load %arg2[%c0_11, %c0_12, %c0_13, %c2, %c0_14] : memref<1x1x10x18x4xbf16, #tpu.memory_space<vmem>>, vector<1x1x8x16x4xbf16>
    %9 = vector.shape_cast %8 : vector<1x1x8x16x4xbf16> to vector<8x16x4xbf16>
    %10 = vector.shape_cast %9 : vector<8x16x4xbf16> to vector<128x4xbf16>
    %c0_15 = arith.constant 0 : index
    %c8 = arith.constant 8 : index
    %11 = vector.load %arg6[%c0_15, %c8] : memref<128x36xbf16, #tpu.memory_space<vmem>>, vector<128x4xbf16>
    tpu.vector_store %arg6[%c0_15, %c8], %10 {strides = array<i32>} : memref<128x36xbf16, #tpu.memory_space<vmem>>, vector<128x4xbf16>,
    %c0_16 = arith.constant 0 : index
    %c0_17 = arith.constant 0 : index
    %c1_18 = arith.constant 1 : index
    %c0_19 = arith.constant 0 : index
    %c0_20 = arith.constant 0 : index
    %12 = vector.load %arg2[%c0_16, %c0_17, %c1_18, %c0_19, %c0_20] : memref<1x1x10x18x4xbf16, #tpu.memory_space<vmem>>, vector<1x1x8x16x4xbf16>
    %13 = vector.shape_cast %12 : vector<1x1x8x16x4xbf16> to vector<8x16x4xbf16>
    %14 = vector.shape_cast %13 : vector<8x16x4xbf16> to vector<128x4xbf16>
    %c0_21 = arith.constant 0 : index
    %c12 = arith.constant 12 : index
    %15 = vector.load %arg6[%c0_21, %c12] : memref<128x36xbf16, #tpu.memory_space<vmem>>, vector<128x4xbf16>
    tpu.vector_store %arg6[%c0_21, %c12], %14 {strides = array<i32>} : memref<128x36xbf16, #tpu.memory_space<vmem>>, vector<128x4xbf16>,
    %c0_22 = arith.constant 0 : index
    %c0_23 = arith.constant 0 : index
    %c1_24 = arith.constant 1 : index
    %c1_25 = arith.constant 1 : index
    %c0_26 = arith.constant 0 : index
    %16 = vector.load %arg2[%c0_22, %c0_23, %c1_24, %c1_25, %c0_26] : memref<1x1x10x18x4xbf16, #tpu.memory_space<vmem>>, vector<1x1x8x16x4xbf16>
    %17 = vector.shape_cast %16 : vector<1x1x8x16x4xbf16> to vector<8x16x4xbf16>
    %18 = vector.shape_cast %17 : vector<8x16x4xbf16> to vector<128x4xbf16>
    %c0_27 = arith.constant 0 : index
    %c16 = arith.constant 16 : index
    %19 = vector.load %arg6[%c0_27, %c16] : memref<128x36xbf16, #tpu.memory_space<vmem>>, vector<128x4xbf16>
    tpu.vector_store %arg6[%c0_27, %c16], %18 {strides = array<i32>} : memref<128x36xbf16, #tpu.memory_space<vmem>>, vector<128x4xbf16>,
    %c0_28 = arith.constant 0 : index
    %c0_29 = arith.constant 0 : index
    %c1_30 = arith.constant 1 : index
    %c2_31 = arith.constant 2 : index
    %c0_32 = arith.constant 0 : index
    %20 = vector.load %arg2[%c0_28, %c0_29, %c1_30, %c2_31, %c0_32] : memref<1x1x10x18x4xbf16, #tpu.memory_space<vmem>>, vector<1x1x8x16x4xbf16>
    %21 = vector.shape_cast %20 : vector<1x1x8x16x4xbf16> to vector<8x16x4xbf16>
    %22 = vector.shape_cast %21 : vector<8x16x4xbf16> to vector<128x4xbf16>
    %c0_33 = arith.constant 0 : index
    %c20 = arith.constant 20 : index
    %23 = vector.load %arg6[%c0_33, %c20] : memref<128x36xbf16, #tpu.memory_space<vmem>>, vector<128x4xbf16>
    tpu.vector_store %arg6[%c0_33, %c20], %22 {strides = array<i32>} : memref<128x36xbf16, #tpu.memory_space<vmem>>, vector<128x4xbf16>,
    %c0_34 = arith.constant 0 : index
    %c0_35 = arith.constant 0 : index
    %c2_36 = arith.constant 2 : index
    %c0_37 = arith.constant 0 : index
    %c0_38 = arith.constant 0 : index
    %24 = vector.load %arg2[%c0_34, %c0_35, %c2_36, %c0_37, %c0_38] : memref<1x1x10x18x4xbf16, #tpu.memory_space<vmem>>, vector<1x1x8x16x4xbf16>
    %25 = vector.shape_cast %24 : vector<1x1x8x16x4xbf16> to vector<8x16x4xbf16>
    %26 = vector.shape_cast %25 : vector<8x16x4xbf16> to vector<128x4xbf16>
    %c0_39 = arith.constant 0 : index
    %c24 = arith.constant 24 : index
    %27 = vector.load %arg6[%c0_39, %c24] : memref<128x36xbf16, #tpu.memory_space<vmem>>, vector<128x4xbf16>
    tpu.vector_store %arg6[%c0_39, %c24], %26 {strides = array<i32>} : memref<128x36xbf16, #tpu.memory_space<vmem>>, vector<128x4xbf16>,
    %c0_40 = arith.constant 0 : index
    %c0_41 = arith.constant 0 : index
    %c2_42 = arith.constant 2 : index
    %c1_43 = arith.constant 1 : index
    %c0_44 = arith.constant 0 : index
    %28 = vector.load %arg2[%c0_40, %c0_41, %c2_42, %c1_43, %c0_44] : memref<1x1x10x18x4xbf16, #tpu.memory_space<vmem>>, vector<1x1x8x16x4xbf16>
    %29 = vector.shape_cast %28 : vector<1x1x8x16x4xbf16> to vector<8x16x4xbf16>
    %30 = vector.shape_cast %29 : vector<8x16x4xbf16> to vector<128x4xbf16>
    %c0_45 = arith.constant 0 : index
    %c28 = arith.constant 28 : index
    %31 = vector.load %arg6[%c0_45, %c28] : memref<128x36xbf16, #tpu.memory_space<vmem>>, vector<128x4xbf16>
    tpu.vector_store %arg6[%c0_45, %c28], %30 {strides = array<i32>} : memref<128x36xbf16, #tpu.memory_space<vmem>>, vector<128x4xbf16>,
    %c0_46 = arith.constant 0 : index
    %c0_47 = arith.constant 0 : index
    %c2_48 = arith.constant 2 : index
    %c2_49 = arith.constant 2 : index
    %c0_50 = arith.constant 0 : index
    %32 = vector.load %arg2[%c0_46, %c0_47, %c2_48, %c2_49, %c0_50] : memref<1x1x10x18x4xbf16, #tpu.memory_space<vmem>>, vector<1x1x8x16x4xbf16>
    %33 = vector.shape_cast %32 : vector<1x1x8x16x4xbf16> to vector<8x16x4xbf16>
    %34 = vector.shape_cast %33 : vector<8x16x4xbf16> to vector<128x4xbf16>
    %c0_51 = arith.constant 0 : index
    %c32 = arith.constant 32 : index
    %35 = vector.load %arg6[%c0_51, %c32] : memref<128x36xbf16, #tpu.memory_space<vmem>>, vector<128x4xbf16>
    tpu.vector_store %arg6[%c0_51, %c32], %34 {strides = array<i32>} : memref<128x36xbf16, #tpu.memory_space<vmem>>, vector<128x4xbf16>,
    %c0_52 = arith.constant 0 : index
    %c0_53 = arith.constant 0 : index
    %36 = vector.load %arg6[%c0_52, %c0_53] : memref<128x36xbf16, #tpu.memory_space<vmem>>, vector<128x36xbf16>
    %c0_54 = arith.constant 0 : index
    %c0_55 = arith.constant 0 : index
    %37 = vector.load %arg3[%c0_54, %c0_55] : memref<36x64xbf16, #tpu.memory_space<vmem>>, vector<36x64xbf16>
    %cst = arith.constant dense<0.000000e+00> : vector<128x64xf32>
    %38 = tpu.matmul %36, %37, %cst {dimension_numbers = #tpu.dot_dimension_numbers<[1], [0], [0], [1], [0, 0, 1, 1], [], []>} : vector<128x36xbf16>, vector<36x64xbf16>, vector<128x64xf32> -> vector<128x64xf32>
    %c0_56 = arith.constant 0 : index
    %c0_57 = arith.constant 0 : index
    %39 = vector.load %arg4[%c0_56, %c0_57] : memref<1x64xf32, #tpu.memory_space<vmem>>, vector<1x64xf32>
    %40 = vector.broadcast %39 : vector<1x64xf32> to vector<128x64xf32>
    %41 = arith.addf %38, %40 : vector<128x64xf32>
    %cst_58 = arith.constant 0.000000e+00 : f32
    %42 = vector.broadcast %cst_58 : f32 to vector<128x64xf32>
    %43 = arith.maximumf %41, %42 : vector<128x64xf32>
    %44 = arith.truncf %43 : vector<128x64xf32> to vector<128x64xbf16>
    %c0_59 = arith.constant 0 : index
    %c0_60 = arith.constant 0 : index
    %c0_61 = arith.constant 0 : index
    %c0_62 = arith.constant 0 : index
    %45 = vector.load %arg5[%c0_59, %c0_60, %c0_61, %c0_62] : memref<1x1x128x64xbf16, #tpu.memory_space<vmem>>, vector<1x1x128x64xbf16>
    %46 = vector.shape_cast %45 : vector<1x1x128x64xbf16> to vector<128x64xbf16>
    %47 = vector.shape_cast %44 : vector<128x64xbf16> to vector<1x1x128x64xbf16>
    tpu.vector_store %arg5[%c0_59, %c0_60, %c0_61, %c0_62], %47 {strides = array<i32>} : memref<1x1x128x64xbf16, #tpu.memory_space<vmem>>, vector<1x1x128x64xbf16>,
    return
  }
  func.func @transform_0(%arg0: i32, %arg1: i32) -> (i32, i32, i32, i32, i32) {
    %c0_i32 = arith.constant 0 : i32
    %c0_i32_0 = arith.constant 0 : i32
    %c0_i32_1 = arith.constant 0 : i32
    %c0_i32_2 = arith.constant 0 : i32
    return %arg0, %arg1, %c0_i32, %c0_i32_0, %c0_i32_1 : i32, i32, i32, i32, i32
  }
  func.func @transform_1(%arg0: i32, %arg1: i32) -> (i32, i32) {
    %c0_i32 = arith.constant 0 : i32
    %c0_i32_0 = arith.constant 0 : i32
    %c0_i32_1 = arith.constant 0 : i32
    return %c0_i32, %c0_i32_0 : i32, i32
  }
  func.func @transform_2(%arg0: i32, %arg1: i32) -> (i32, i32) {
    %c0_i32 = arith.constant 0 : i32
    %c0_i32_0 = arith.constant 0 : i32
    %c0_i32_1 = arith.constant 0 : i32
    return %c0_i32, %c0_i32_0 : i32, i32
  }
  func.func @transform_3(%arg0: i32, %arg1: i32) -> (i32, i32, i32, i32) {
    %c0_i32 = arith.constant 0 : i32
    %c0_i32_0 = arith.constant 0 : i32
    %c0_i32_1 = arith.constant 0 : i32
    return %arg0, %arg1, %c0_i32, %c0_i32_0 : i32, i32, i32, i32
  }
}

</mosaic_0001>

<bundles_post_ra>
// kernel: tpu_custom_call.1
= control target key start
LH: loop header
LB: loop body
LE: loop exit
PB: predicated region body
PF: predicated region fallthrough
CT: control target
= control target key end

     0   :  { %s2444_s12 = smov 0   ;;  %s2446_s13 = smov 0   ;;  %s3263_s0 = inlined_call_operand.vmem [shape: bf16[2,2,10,18,4], index: 0, kind: input, shape index: {}]   ;;  %s3264_s1 = inlined_call_operand.vmem [shape: bf16[36,64], index: 1, kind: input, shape index: {}]   ;;  %s3265_s2 = inlined_call_operand.vmem [shape: f32[1,64], index: 2, kind: input, shape index: {}]   ;;  %s3266_s3 = inlined_call_operand.vmem [shape: bf16[2,2,128,64], index: 3, kind: output, shape index: {}]  }
   0x1   :  { %s2448_s14 = smov 0   ;;  %s2450_s15 = smov 0  }
   0x2   :  { %s2452_s16 = smov 0  }
   0x3 LB: > { %s22_s17 = sadd.s32 1, %s2406_s14  ;;  %s25_s18 = sadd.s32 1, %s2410_s15  ;;  %s2414_s16 = sphi %s2452_s16, %s13_s16   ;;  %s2410_s15 = sphi %s2450_s15, %s3274_s15   ;;  %s2406_s14 = sphi %s2448_s14, %s3273_s14   ;;  %s2402_s13 = sphi %s2446_s13, %s3272_s13   ;;  %s2398_s12 = sphi %s2444_s12, %s3271_s12  }
   0x4   : > { %p23_p0 = scmp.ge.s32.totalorder %s22_s17, 2  ;;  %p2099_p1 = scmp.ge.s32.totalorder %s2414_s16, 1 }
   0x5   : > { %p157_p2 = scmp.lt.s32.totalorder %s2414_s16, 5 }
   0x6   : > { %s3276_s17 = smov (%p23_p0, %s22_s17), 0  ;;  %s3278_s18 = smov (!%p23_p0, %s25_s18), %s2410_s15 }
   0x7   : > { %p158_p3 = pnand %p2099_p1, %p157_p2  ;;  %p27_p4 = scmp.ge.s32.totalorder %s3278_s18, 2 }
   0x8   : > { %p189_p5 = scmp.lt.s32.totalorder (!%p158_p3), %s2402_s13, 1  ;;  %p191_p6 = scmp.lt.s32.totalorder (!%p158_p3), %s2398_s12, 1 }
   0x9   : > { %s3280_s18 = smov (%p27_p4, %s3278_s18), 0  ;;  %161 = sbr.rel (%p158_p3) target bundleno = 632 (0x278), region = 32 }
   0xa   : > { %s2416_s26 = smov (!%p158_p3), 4   ;;  %s2417_s27 = smov (!%p158_p3), 8  }
   0xb   : > { %s2418_s28 = smov (!%p158_p3), 12   ;;  %s2419_s29 = smov (!%p158_p3), 16  }
   0xc   : > { %s2420_s30 = smov (!%p158_p3), 20   ;;  %s2421_s4 = smov (!%p158_p3), 24  }
   0xd   : > { %s2422_s5 = smov (!%p158_p3), 28   ;;  %s2423_s6 = smov (!%p158_p3), 32  }
   0xe   : > { %s3282_s13 = smov (!%p189_p5, %s2402_s13), 1  ;;  %s3284_s12 = smov (!%p191_p6, %s2398_s12), 1  ;;  %vm265_vm0 = vsmask.f32 3328  ;;  %vm266_vm1 = vsmask.f32 7440 }
   0xf   : > { %s2326_s19 = smul.u32 60, %s3282_s13  ;;  %vm2494_vm2 = vmor %vm265_vm0, %vm266_vm1  ;;  %vm573_vm3 = vcmask 1042432   ;;  %vm574_vm4 = vcmask 1046532   ;;  %vm224_vm6 = vcmask 27648   ;;  %vm508_vm7 = vcmask 60448  }
  0x10   : > { %s2325_s20 = smul.u32 30, %s3284_s12  ;;  %vm2562_vm5 = vmor %vm573_vm3, %vm574_vm4  ;;  %vm680_vm8 = vcmask 93248   ;;  %vm778_vm9 = vcmask 126048   ;;  %vm1059_vm10 = vcmask 158848   ;;  %vm1228_vm11 = vcmask 191648  }
  0x11   : > { %vm1898_vm12 = vcmask 1041408   ;;  %vm1326_vm13 = vcmask 224448   ;;  %vm1607_vm14 = vcmask 257248   ;;  %vm1776_vm15 = vcmask 290048  }
  0x12   : > { %s195_s21 = sadd.s32 %s2326_s19, %s2325_s20  ;;  %vm1873_vm0 = vcmask 293888   ;;  %s2101_s20 = sshll.u32 %s3284_s12, 4  ;;  %vm1983_vm1 = vcmask 519168  }
  0x13   : > { %s2100_s22 = sshll.u32 %s195_s21, 2  ;;  %s2102_s21 = sshll.u32 %s3282_s13, 5 }
  0x14   : > { %s2483_s25 = scalar_lea.vmem %s3263_s0, %s2100_s22  ;;  %s204_s24 = sadd.s32 %s2102_s21, %s2101_s20 }
  0x15   : > { %v244_v0 = vld [vmem:[%s2483_s25 + $0xc] sm:$0xf]  ;;  %v245_v1 = vld [vmem:[%s2483_s25 + $0x10] sm:$0xf]  ;;  %v241_v2 = vld [vmem:[%s2483_s25] sm:$0xf] }
  0x16   : > { %v293_v3 = vshrl.u32 %v244_v0, 16  ;;  %v296_v4 = vshll.u32 %v244_v0, 16  ;;  %v302_v5 = vshll.u32 %v245_v1, 16  ;;  %v306_v6 = vshrl.u32 %v245_v1, 16  ;;  %v242_v7 = vld [vmem:[%s2483_s25 + $0x4] sm:$0xf] }
  0x17   : > { %v269_v8 = vshrl.u32 %v241_v2, 16  ;;  %v272_v9 = vshll.u32 %v241_v2, 16  ;;  %v278_v10 = vshll.u32 %v242_v7, 16  ;;  %v282_v11 = vshrl.u32 %v242_v7, 16  ;;  %v246_v12 = vld [vmem:[%s2483_s25 + $0x14] sm:$0x1] }
  0x18   : > { %v295_v13 = vrot.slane %v293_v3, 4  ;;  %v298_v14 = vrot.slane %v296_v4, 5  ;;  %v304_v15 = vrot.slane %v302_v5, 5  ;;  %v308_v16 = vrot.slane %v306_v6, 4  ;;  %v243_v17 = vld [vmem:[%s2483_s25 + $0x8] sm:$0x1] }
  0x19   : > { %v271_v18 = vrot.slane %v269_v8, 4  ;;  %v274_v19 = vrot.slane %v272_v9, 5  ;;  %v284_v20 = vrot.slane %v282_v11, 4  ;;  %v251_v21 = vld [vmem:[%s2483_s25 + $0x28] sm:$0xf]  ;;  %v280_v23 = vrot.slane %v278_v10, 5 }
  0x1a   : > { %v299_v22 = vor.u32 %v298_v14, %v295_v13  ;;  %v309_v24 = vor.u32 %v308_v16, %v304_v15  ;;  %v312_v27 = vshll.u32 %v246_v12, 16  ;;  %v350_v28 = vshll.u32 %v251_v21, 16  ;;  %v250_v30 = vld [vmem:[%s2483_s25 + $0x24] sm:$0xf]  ;;  %v247_v35 = vld [vmem:[%s2483_s25 + $0x18] sm:$0xf] }
  0x1b   : > { %v275_v26 = vor.u32 %v274_v19, %v271_v18  ;;  %v354_v29 = vshrl.u32 %v251_v21, 16  ;;  %v285_v32 = vor.u32 %v284_v20, %v280_v23  ;;  %v288_v33 = vshll.u32 %v243_v17, 16  ;;  %v248_v40 = vld [vmem:[%s2483_s25 + $0x1c] sm:$0xf]  ;;  %v252_v44 = vld [vmem:[%s2483_s25 + $0x2c] sm:$0x1] }
  0x1c   : > { %v300_v31 = vrot.slane %v299_v22, 4  ;;  %v2502_v37 = vrot.slane %v350_v28, 5  ;;  %v341_v39 = vshrl.u32 %v250_v30, 16  ;;  %v310_v42 = vrot.slane %v309_v24, 4  ;;  %v256_v50 = vld [vmem:[%s2483_s25 + $0x3c] sm:$0xf] }
  0x1d   : > { %v276_v34 = vrot.slane %v275_v26, 4  ;;  %v356_v38 = vrot.slane %v354_v29, 4  ;;  %v314_v43 = vrot.slane %v312_v27, 5  ;;  %v344_v45 = vshll.u32 %v250_v30, 16  ;;  %v254_v59 = vld [vmem:[%s2483_s25 + $0x34] sm:$0xf] }
  0x1e   : > { %v305_v36 = vsel %vm2494_vm2, %v300_v31, %v304_v15  ;;  %v286_v46 = vrot.slane %v285_v32, 4  ;;  %v290_v47 = vrot.slane %v288_v33, 5  ;;  %v317_v48 = vshrl.u32 %v247_v35, 16  ;;  %v249_v6 = vld [vmem:[%s2483_s25 + $0x20] sm:$0x1] }
  0x1f   : > { %464 = vrot.lane.b32.xlu1 %v305_v36, %s2416_s26  ;;  %v281_v41 = vsel %vm2494_vm2, %v276_v34, %v280_v23  ;;  %v320_v49 = vshll.u32 %v247_v35, 16  ;;  %v343_v51 = vrot.slane %v341_v39, 4  ;;  %v346_v52 = vrot.slane %v344_v45, 5  ;;  %v257_v10 = vld [vmem:[%s2483_s25 + $0x40] sm:$0xf] }
  0x20   : > { %460 = vrot.lane.b32.xlu0 %v281_v41, %s2416_s26  ;;  %v326_v53 = vshll.u32 %v248_v40, 16  ;;  %v330_v54 = vshrl.u32 %v248_v40, 16  ;;  %v357_v55 = vor.u32 %v356_v38, %v2502_v37  ;;  %v360_v56 = vshll.u32 %v252_v44, 16  ;;  %v255_v15 = vld [vmem:[%s2483_s25 + $0x38] sm:$0x1] }
  0x21   : > { %v319_v57 = vrot.slane %v317_v48, 4  ;;  %v322_v58 = vrot.slane %v320_v49, 5  ;;  %v389_v61 = vshrl.u32 %v256_v50, 16  ;;  %v392_v62 = vshll.u32 %v256_v50, 16  ;;  %v260_v20 = vld [vmem:[%s2483_s25 + $0x4c] sm:$0xf] }
  0x22   : > { %v332_v60 = vrot.slane %v330_v54, 4  ;;  %v315_v63 = vsel %vm2494_vm2, %v310_v42, %v314_v43  ;;  %v328_v1 = vrot.slane %v326_v53, 5  ;;  %v291_v2 = vsel %vm2494_vm2, %v286_v46, %v290_v47  ;;  %v253_v21 = vld [vmem:[%s2483_s25 + $0x30] sm:$0xf]  ;;  %v259_v26 = vld [vmem:[%s2483_s25 + $0x48] sm:$0xf] }
  0x23   : > { %v323_v0 = vor.u32 %v322_v58, %v319_v57  ;;  %v347_v3 = vor.u32 %v346_v52, %v343_v51  ;;  %v374_v4 = vshll.u32 %v254_v59, 16  ;;  %v378_v5 = vshrl.u32 %v254_v59, 16  ;;  %v261_v48 = vld [vmem:[%s2483_s25 + $0x50] sm:$0x1]  ;;  %v263_v53 = vld [vmem:[%s2483_s25 + $0x58] sm:$0xf] }
  0x24   : > { %v358_v7 = vrot.slane %v357_v55, 4  ;;  %v362_v8 = vrot.slane %v360_v56, 5  ;;  %v391_v11 = vrot.slane %v389_v61, 4  ;;  %v394_v12 = vrot.slane %v392_v62, 5  ;;  %v258_v55 = vld [vmem:[%s2483_s25 + $0x44] sm:$0x1] }
  0x25   : > { %v324_v9 = vrot.slane %v323_v0, 4  ;;  %v333_v13 = vor.u32 %v332_v60, %v328_v1  ;;  %v376_v16 = vrot.slane %v374_v4, 5  ;;  %v380_v17 = vrot.slane %v378_v5, 4  ;;  %v262_v56 = vld [vmem:[%s2483_s25 + $0x54] sm:$0xf] }
  0x26   : > { %v336_v18 = vshll.u32 %v249_v6, 16  ;;  %v348_v19 = vrot.slane %v347_v3, 4  ;;  %v363_v22 = vsel %vm2494_vm2, %v358_v7, %v362_v8  ;;  %v395_v27 = vor.u32 %v394_v12, %v391_v11 }
  0x27   : > { %466 = vrot.lane.b32.xlu1 %v315_v63, %s2416_s26  ;;  %v329_v14 = vsel %vm2494_vm2, %v324_v9, %v328_v1  ;;  %v334_v23 = vrot.slane %v333_v13, 4  ;;  %v398_v28 = vshll.u32 %v257_v10, 16  ;;  %v402_v29 = vshrl.u32 %v257_v10, 16  ;;  %v264_v10 = vld [vmem:[%s2483_s25 + $0x5c] sm:$0x1] }
  0x28   : > { %462 = vrot.lane.b32.xlu0 %v291_v2, %s2416_s26  ;;  %468 = vrot.lane.b32.xlu2 %v329_v14, %s2416_s26  ;;  %v338_v24 = vrot.slane %v336_v18, 5  ;;  %v384_v30 = vshll.u32 %v255_v15, 16  ;;  %v381_v31 = vor.u32 %v380_v17, %v376_v16  ;;  %v422_v32 = vshll.u32 %v260_v20, 16  ;;  %v525_v17 = vld [vmem:[%s2483_s25] sm:$0xe] }
  0x29   : > { %v426_v33 = vshrl.u32 %v260_v20, 16  ;;  %v365_v34 = vshrl.u32 %v253_v21, 16  ;;  %v353_v35 = vsel %vm2494_vm2, %v348_v19, %v2502_v37  ;;  %v413_v36 = vshrl.u32 %v259_v26, 16  ;;  %v526_v18 = vld [vmem:[%s2483_s25 + $0x4] sm:$0xf] }
  0x2a   : > { %v416_v38 = vshll.u32 %v259_v26, 16  ;;  %v368_v39 = vshll.u32 %v253_v21, 16  ;;  %v339_v40 = vsel %vm2494_vm2, %v334_v23, %v338_v24  ;;  %v396_v42 = vrot.slane %v395_v27, 4 }
  0x2b   : > { %v367_v41 = vrot.slane %v365_v34, 4  ;;  %v400_v43 = vrot.slane %v398_v28, 5  ;;  %v382_v45 = vrot.slane %v381_v31, 4  ;;  %v386_v37 = vrot.slane %v384_v30, 5  ;;  %v530_v34 = vld [vmem:[%s2483_s25 + $0x14] sm:$0x1] }
  0x2c   : > { %v370_v44 = vrot.slane %v368_v39, 5  ;;  %v424_v46 = vrot.slane %v422_v32, 5  ;;  %v428_v47 = vrot.slane %v426_v33, 4  ;;  %v415_v49 = vrot.slane %v413_v36, 4 }
  0x2d   : > { %v418_v50 = vrot.slane %v416_v38, 5  ;;  %v404_v52 = vrot.slane %v402_v29, 4  ;;  %v401_v57 = vsel %vm2494_vm2, %v396_v42, %v400_v43  ;;  %v387_v58 = vsel %vm2494_vm2, %v382_v45, %v386_v37  ;;  %v529_v29 = vld [vmem:[%s2483_s25 + $0x10] sm:$0xf]  ;;  %v527_v38 = vld [vmem:[%s2483_s25 + $0x8] sm:$0x1] }
  0x2e   : > { %v371_v51 = vor.u32 %v370_v44, %v367_v41  ;;  %v429_v59 = vor.u32 %v428_v47, %v424_v46  ;;  %v432_v60 = vshll.u32 %v261_v48, 16  ;;  %v446_v62 = vshll.u32 %v263_v53, 16  ;;  %v532_v42 = vld [vmem:[%s2483_s25 + $0x1c] sm:$0xf]  ;;  %v535_v47 = vld [vmem:[%s2483_s25 + $0x28] sm:$0xf] }
  0x2f   : > { %474 = vrot.lane.b32.xlu1 %v363_v22, %s2416_s26  ;;  %v419_v61 = vor.u32 %v418_v50, %v415_v49  ;;  %v450_v63 = vshrl.u32 %v263_v53, 16  ;;  %v405_v0 = vor.u32 %v404_v52, %v400_v43  ;;  %v408_v2 = vshll.u32 %v258_v55, 16  ;;  %v533_v49 = vld [vmem:[%s2483_s25 + $0x20] sm:$0x1] }
  0x30   : > { %472 = vrot.lane.b32.xlu0 %v353_v35, %s2416_s26  ;;  %470 = vrot.lane.b32.xlu2 %v339_v40, %s2416_s26  ;;  %v372_v54 = vrot.slane %v371_v51, 4  ;;  %v437_v3 = vshrl.u32 %v262_v56, 16  ;;  %v440_v4 = vshll.u32 %v262_v56, 16  ;;  %v430_v5 = vrot.slane %v429_v59, 4  ;;  %v528_v35 = vld [vmem:[%s2483_s25 + $0xc] sm:$0xe] }
  0x31   : > { %v434_v6 = vrot.slane %v432_v60, 5  ;;  %v420_v7 = vrot.slane %v419_v61, 4  ;;  %v448_v8 = vrot.slane %v446_v62, 5  ;;  %v452_v9 = vrot.slane %v450_v63, 4  ;;  %v531_v51 = vld [vmem:[%s2483_s25 + $0x18] sm:$0xe] }
  0x32   : > { %v377_v1 = vsel %vm2494_vm2, %v372_v54, %v376_v16  ;;  %v406_v11 = vrot.slane %v405_v0, 4  ;;  %v410_v12 = vrot.slane %v408_v2, 5  ;;  %v439_v13 = vrot.slane %v437_v3, 4  ;;  %v538_v56 = vld [vmem:[%s2483_s25 + $0x34] sm:$0xf] }
  0x33   : > { %v442_v14 = vrot.slane %v440_v4, 5  ;;  %v435_v15 = vsel %vm2494_vm2, %v430_v5, %v434_v6  ;;  %v425_v16 = vsel %vm2494_vm2, %v420_v7, %v424_v46  ;;  %v453_v19 = vor.u32 %v452_v9, %v448_v8  ;;  %v534_v46 = vld [vmem:[%s2483_s25 + $0x24] sm:$0xe]  ;;  %v539_v61 = vld [vmem:[%s2483_s25 + $0x38] sm:$0x1] }
  0x34   : > { %v456_v20 = vshll.u32 %v264_v10, 16  ;;  %v411_v21 = vsel %vm2494_vm2, %v406_v11, %v410_v12  ;;  %v2104_v23 = vrot.slane %v525_v17, 9  ;;  %v578_v24 = vrot.slane %v526_v18, 5  ;;  %v537_v62 = vld [vmem:[%s2483_s25 + $0x30] sm:$0xe] }
  0x35   : > { %v443_v22 = vor.u32 %v442_v14, %v439_v13  ;;  %v454_v27 = vrot.slane %v453_v19, 4  ;;  %v585_v32 = vrot.slane %v529_v29, 5  ;;  %v588_v40 = vrot.slane %v530_v34, 5  ;;  %v536_v0 = vld [vmem:[%s2483_s25 + $0x2c] sm:$0x1] }
  0x36   : > { %v458_v28 = vrot.slane %v456_v20, 5  ;;  %v579_v31 = vsel %vm2562_vm5, %v2104_v23, %v578_v24  ;;  %v2105_v41 = vrot.slane %v528_v35, 9  ;;  %v580_v43 = vrot.slane %v578_v24, 4  ;;  %v541_v4 = vld [vmem:[%s2483_s25 + $0x40] sm:$0xf] }
  0x37   : > { %480 = vrot.lane.b32.xlu1 %v401_v57, %s2416_s26  ;;  %v444_v30 = vrot.slane %v443_v22, 4  ;;  %v587_v39 = vrot.slane %v585_v32, 4  ;;  %v581_v44 = vrot.slane %v527_v38, 5  ;;  %v592_v48 = vrot.slane %v532_v42, 5  ;;  %v543_v9 = vld [vmem:[%s2483_s25 + $0x48] sm:$0xe] }
  0x38   : > { %478 = vrot.lane.b32.xlu0 %v387_v58, %s2416_s26  ;;  %476 = vrot.lane.b32.xlu2 %v377_v1, %s2416_s26  ;;  %v459_v33 = vsel %vm2494_vm2, %v454_v27, %v458_v28  ;;  %v586_v37 = vsel %vm2562_vm5, %v2105_v41, %v585_v32  ;;  %v2107_v52 = vrot.slane %v534_v46, 9  ;;  %v599_v53 = vrot.slane %v535_v47, 5  ;;  %v544_v10 = vld [vmem:[%s2483_s25 + $0x4c] sm:$0xf]  ;;  %v542_v12 = vld [vmem:[%s2483_s25 + $0x44] sm:$0x1] }
  0x39   : > { %v449_v36 = vsel %vm2494_vm2, %v444_v30, %v448_v8  ;;  %v589_v45 = vsel %vm2562_vm5, %v587_v39, %v588_v40  ;;  %v582_v50 = vsel %vm2562_vm5, %v580_v43, %v581_v44  ;;  %v594_v54 = vrot.slane %v592_v48, 4  ;;  %v540_v14 = vld [vmem:[%s2483_s25 + $0x3c] sm:$0xe]  ;;  %v547_v19 = vld [vmem:[%s2483_s25 + $0x58] sm:$0xf] }
  0x3a   : > { %v595_v55 = vrot.slane %v533_v49, 5  ;;  %v2106_v57 = vrot.slane %v531_v51, 9  ;;  %v600_v58 = vsel %vm2562_vm5, %v2107_v52, %v599_v53  ;;  %v606_v59 = vrot.slane %v538_v56, 5  ;;  %v548_v24 = vld [vmem:[%s2483_s25 + $0x5c] sm:$0x1] }
  0x3b   : > { %v609_v2 = vrot.slane %v539_v61, 5  ;;  %v2108_v3 = vrot.slane %v537_v62, 9  ;;  %v601_v5 = vrot.slane %v599_v53, 4  ;;  %v602_v6 = vrot.slane %v536_v0, 5  ;;  %v546_v27 = vld [vmem:[%s2483_s25 + $0x54] sm:$0xe] }
  0x3c   : > { %v596_v60 = vsel %vm2562_vm5, %v594_v54, %v595_v55  ;;  %v593_v63 = vsel %vm2562_vm5, %v2106_v57, %v592_v48  ;;  %v608_v1 = vrot.slane %v606_v59, 4  ;;  %v613_v11 = vrot.slane %v541_v4, 5  ;;  %v545_v29 = vld [vmem:[%s2483_s25 + $0x50] sm:$0x1]  ;;  %v212_v39 = vld [vmem:[%s2483_s25 + $0x18] sm:$0xf] }
  0x3d   : > { %v607_v8 = vsel %vm2562_vm5, %v2108_v3, %v606_v59  ;;  %v603_v13 = vsel %vm2562_vm5, %v601_v5, %v602_v6  ;;  %v616_v18 = vrot.slane %v542_v12, 5  ;;  %v2109_v20 = vrot.slane %v540_v14, 9  ;;  %229 = vst.msk [vmem:[#allocation2 + $0x10] sm:$0xf] %vm224_vm6, %v212_v39  ;;  %v210_v40 = vld [vmem:[%s2483_s25 + $0xc] sm:$0xf] }
  0x3e   : > { %v610_v7 = vsel %vm2562_vm5, %v608_v1, %v609_v2  ;;  %v615_v17 = vrot.slane %v613_v11, 4  ;;  %v627_v22 = vrot.slane %v547_v19, 5  ;;  %v2111_v32 = vrot.slane %v546_v27, 9  ;;  %v208_v41 = vld [vmem:[%s2483_s25] sm:$0xf] }
  0x3f   : > { %486 = vrot.lane.b32.xlu1 %v435_v15, %s2416_s26  ;;  %v2110_v15 = vrot.slane %v543_v9, 9  ;;  %v614_v28 = vsel %vm2562_vm5, %v2109_v20, %v613_v11  ;;  %v623_v34 = vrot.slane %v545_v29, 5  ;;  %227 = vst.msk [vmem:[#allocation2 + $0x8] sm:$0xf] %vm224_vm6, %v210_v40  ;;  %v2114_v42 = vld [vmem:[%s2483_s25 + $0x18] sm:$0xf] }
  0x40   : > { %484 = vrot.lane.b32.xlu0 %v425_v16, %s2416_s26  ;;  %482 = vrot.lane.b32.xlu2 %v411_v21, %s2416_s26  ;;  %v620_v16 = vrot.slane %v544_v10, 5  ;;  %v617_v23 = vsel %vm2562_vm5, %v615_v17, %v616_v18  ;;  %v629_v30 = vrot.slane %v627_v22, 4  ;;  %225 = vst.msk [vmem:[#allocation2] sm:$0xf] %vm224_vm6, %v208_v41  ;;  %v2113_v43 = vld [vmem:[%s2483_s25 + $0x10] sm:$0xf] }
  0x41   : > { %v2112_v44 = vld [vmem:[%s2483_s25 + $0xc] sm:$0xf]  ;;  %v209_v46 = vld [vmem:[%s2483_s25 + $0x4] sm:$0xf]  ;;  %v2117_v47 = vld [vmem:[%s2483_s25 + $0x28] sm:$0xf] }
  0x42   : > { %v621_v21 = vsel %vm2562_vm5, %v2110_v15, %v620_v16  ;;  %226 = vst.msk [vmem:[#allocation2 + $0x4] sm:$0xf] %vm224_vm6, %v209_v46  ;;  %v2116_v48 = vld [vmem:[%s2483_s25 + $0x24] sm:$0xf]  ;;  %v2115_v49 = vld [vmem:[%s2483_s25 + $0x1c] sm:$0xf] }
  0x43   : > { %v215_v51 = vld [vmem:[%s2483_s25 + $0x28] sm:$0xf]  ;;  %v214_v52 = vld [vmem:[%s2483_s25 + $0x24] sm:$0xf]  ;;  %v2120_v54 = vld [vmem:[%s2483_s25 + $0x3c] sm:$0xf] }
  0x44   : > { %232 = vst.msk [vmem:[#allocation2 + $0x1c] sm:$0xf] %vm224_vm6, %v215_v51  ;;  %v2119_v55 = vld [vmem:[%s2483_s25 + $0x34] sm:$0xf]  ;;  %v2118_v56 = vld [vmem:[%s2483_s25 + $0x30] sm:$0xf] }
  0x45   : > { %231 = vst.msk [vmem:[#allocation2 + $0x18] sm:$0xf] %vm224_vm6, %v214_v52  ;;  %v2129_v57 = vld [vmem:[%s2483_s25 + $0x10] sm:$0xf]  ;;  %v219_v59 = vld [vmem:[%s2483_s25 + $0x40] sm:$0xf] }
  0x46   : > { %236 = vst.msk [vmem:[#allocation2 + $0x2c] sm:$0xf] %vm224_vm6, %v219_v59  ;;  %v217_v61 = vld [vmem:[%s2483_s25 + $0x34] sm:$0xf]  ;;  %v833_v0 = vshrl.u32 %v2129_v57, 16 }
  0x47   : > { %632 = vrot.lane.b32.xlu1 %v579_v31, %s2417_s27  ;;  %v630_v31 = vrot.slane %v548_v24, 5  ;;  %234 = vst.msk [vmem:[#allocation2 + $0x24] sm:$0xf] %vm224_vm6, %v217_v61  ;;  %v2123_v1 = vld [vmem:[%s2483_s25 + $0x4c] sm:$0xf] }
  0x48   : > { %490 = vrot.lane.b32.xlu0 %v459_v33, %s2416_s26  ;;  %488 = vrot.lane.b32.xlu2 %v449_v36, %s2416_s26  ;;  %v622_v33 = vrot.slane %v620_v16, 4  ;;  %v628_v36 = vsel %vm2562_vm5, %v2111_v32, %v627_v22  ;;  %v2122_v4 = vld [vmem:[%s2483_s25 + $0x48] sm:$0xf]  ;;  %v2121_v5 = vld [vmem:[%s2483_s25 + $0x40] sm:$0xf] }
  0x49   : > { %v631_v35 = vsel %vm2562_vm5, %v629_v30, %v630_v31  ;;  %v2130_v6 = vld [vmem:[%s2483_s25 + $0x14] sm:$0x1]  ;;  %v2134_v11 = vld [vmem:[%s2483_s25 + $0x24] sm:$0xf]  ;;  %v2132_v15 = vld [vmem:[%s2483_s25 + $0x1c] sm:$0xf] }
  0x4a   : > { %v624_v38 = vsel %vm2562_vm5, %v622_v33, %v623_v34  ;;  %v222_v12 = vld [vmem:[%s2483_s25 + $0x54] sm:$0xf]  ;;  %v839_v14 = vshll.u32 %v2130_v6, 16  ;;  %v221_v17 = vld [vmem:[%s2483_s25 + $0x4c] sm:$0xf]  ;;  %v871_v22 = vshll.u32 %v2134_v11, 16 }
  0x4b   : > { %239 = vst.msk [vmem:[#allocation2 + $0x38] sm:$0xf] %vm224_vm6, %v222_v12  ;;  %v2131_v18 = vld [vmem:[%s2483_s25 + $0x18] sm:$0xf]  ;;  %v2126_v24 = vld [vmem:[%s2483_s25 + $0x60] sm:$0xf] }
  0x4c   : > { %v857_v29 = vshrl.u32 %v2132_v15, 16  ;;  %v2125_v30 = vld [vmem:[%s2483_s25 + $0x58] sm:$0xf]  ;;  %238 = vst.msk [vmem:[#allocation2 + $0x34] sm:$0xf] %vm224_vm6, %v221_v17  ;;  %v844_v31 = vshrl.u32 %v2131_v18, 16 }
  0x4d   : > { %v847_v32 = vshll.u32 %v2131_v18, 16  ;;  %v2124_v33 = vld [vmem:[%s2483_s25 + $0x54] sm:$0xf]  ;;  %v2135_v40 = vld [vmem:[%s2483_s25 + $0x28] sm:$0xf] }
  0x4e   : > { %v877_v52 = vshll.u32 %v2135_v40, 16  ;;  %v2136_v18 = vld [vmem:[%s2483_s25 + $0x2c] sm:$0x1] }
  0x4f   : > { %638 = vrot.lane.b32.xlu1 %v589_v45, %s2417_s27  ;;  %v213_v45 = vld [vmem:[%s2483_s25 + $0x1c] sm:$0xf]  ;;  %v849_v46 = vrot.slane %v847_v32, 5 }
  0x50   : > { %636 = vrot.lane.b32.xlu0 %v586_v37, %s2417_s27  ;;  %634 = vrot.lane.b32.xlu2 %v582_v50, %s2417_s27  ;;  %230 = vst.msk [vmem:[#allocation2 + $0x14] sm:$0xf] %vm224_vm6, %v213_v45  ;;  %v211_v37 = vld [vmem:[%s2483_s25 + $0x10] sm:$0xf] }
  0x51   : > { %228 = vst.msk [vmem:[#allocation2 + $0xc] sm:$0xf] %vm224_vm6, %v211_v37  ;;  %v216_v50 = vld [vmem:[%s2483_s25 + $0x30] sm:$0xf]  ;;  %v846_v37 = vrot.slane %v844_v31, 4  ;;  %v887_v31 = vshll.u32 %v2136_v18, 16 }
  0x52   : > { %233 = vst.msk [vmem:[#allocation2 + $0x20] sm:$0xf] %vm224_vm6, %v216_v50  ;;  %v2137_v45 = vld [vmem:[%s2483_s25 + $0x30] sm:$0xf] }
  0x53   : > { %v850_v61 = vor.u32 %v849_v46, %v846_v37  ;;  %v889_v46 = vrot.slane %v887_v31, 5 }
  0x57   : > { %644 = vrot.lane.b32.xlu1 %v600_v58, %s2417_s27  ;;  %v2128_v58 = vld [vmem:[%s2483_s25 + $0xc] sm:$0xf] }
  0x58   : > { %642 = vrot.lane.b32.xlu0 %v596_v60, %s2417_s27  ;;  %640 = vrot.lane.b32.xlu2 %v593_v63, %s2417_s27  ;;  %v218_v60 = vld [vmem:[%s2483_s25 + $0x3c] sm:$0xf]  ;;  %v829_v63 = vshll.u32 %v2129_v57, 16  ;;  %v820_v2 = vshrl.u32 %v2128_v58, 16  ;;  %v823_v3 = vshll.u32 %v2128_v58, 16  ;;  %v895_v57 = vshll.u32 %v2137_v45, 16 }
  0x59   : > { %235 = vst.msk [vmem:[#allocation2 + $0x28] sm:$0xf] %vm224_vm6, %v218_v60 }
  0x5a   : > { %v822_v9 = vrot.slane %v820_v2, 4  ;;  %v825_v10 = vrot.slane %v823_v3, 5  ;;  %v2139_v2 = vld [vmem:[%s2483_s25 + $0x38] sm:$0x1]  ;;  %v897_v6 = vrot.slane %v895_v57, 5 }
  0x5c   : > { %v826_v27 = vor.u32 %v825_v10, %v822_v9  ;;  %v851_v10 = vrot.slane %v850_v61, 4 }
  0x5e   : > { %v827_v39 = vrot.slane %v826_v27, 4 }
  0x5f   : > { %650 = vrot.lane.b32.xlu1 %v610_v7, %s2417_s27  ;;  %v2694_v7 = vrot.slane %v829_v63, 5  ;;  %v2127_v63 = vld [vmem:[%s2483_s25 + $0x64] sm:$0xf] }
  0x60   : > { %648 = vrot.lane.b32.xlu0 %v607_v8, %s2417_s27  ;;  %646 = vrot.lane.b32.xlu2 %v603_v13, %s2417_s27  ;;  %v835_v8 = vrot.slane %v833_v0, 4 }
  0x61   : > { %v832_v58 = vsel %vm2494_vm2, %v827_v39, %v2694_v7 }
  0x62   : > { %v836_v19 = vor.u32 %v835_v8, %v2694_v7 }
  0x64   : > { %v837_v34 = vrot.slane %v836_v19, 4  ;;  %v2140_v19 = vld [vmem:[%s2483_s25 + $0x3c] sm:$0xf] }
  0x65   : > { %v916_v32 = vshrl.u32 %v2140_v19, 16 }
  0x67   : > { %656 = vrot.lane.b32.xlu1 %v621_v21, %s2417_s27  ;;  %v868_v21 = vshrl.u32 %v2134_v11, 16  ;;  %v2146_v11 = vld [vmem:[%s2483_s25 + $0x54] sm:$0xf] }
  0x68   : > { %654 = vrot.lane.b32.xlu0 %v617_v23, %s2417_s27  ;;  %652 = vrot.lane.b32.xlu2 %v614_v28, %s2417_s27  ;;  %v220_v23 = vld [vmem:[%s2483_s25 + $0x48] sm:$0xf]  ;;  %v853_v28 = vshll.u32 %v2132_v15, 16 }
  0x69   : > { %237 = vst.msk [vmem:[#allocation2 + $0x30] sm:$0xf] %vm224_vm6, %v220_v23  ;;  %v967_v23 = vshll.u32 %v2146_v11, 16 }
  0x6a   : > { %v2717_v41 = vrot.slane %v853_v28, 5 }
  0x6b   : > { %v969_v39 = vrot.slane %v967_v23, 5 }
  0x6c   : > { %v856_v27 = vsel %vm2494_vm2, %v851_v10, %v2717_v41  ;;  %v2164_v10 = vld [vmem:[%s2483_s25 + $0x3c] sm:$0xe] }
  0x6f   : > { %662 = vrot.lane.b32.xlu1 %v631_v35, %s2417_s27  ;;  %v841_v35 = vrot.slane %v839_v14, 5  ;;  %v2141_v14 = vld [vmem:[%s2483_s25 + $0x40] sm:$0xf] }
  0x70   : > { %660 = vrot.lane.b32.xlu0 %v628_v36, %s2417_s27  ;;  %658 = vrot.lane.b32.xlu2 %v624_v38, %s2417_s27  ;;  %v870_v36 = vrot.slane %v868_v21, 4  ;;  %v873_v38 = vrot.slane %v871_v22, 5  ;;  %v964_v22 = vshrl.u32 %v2146_v11, 16  ;;  %v925_v28 = vshll.u32 %v2141_v14, 16 }
  0x71   : > { %v842_v50 = vsel %vm2494_vm2, %v837_v34, %v841_v35 }
  0x72   : > { %v874_v51 = vor.u32 %v873_v38, %v870_v36  ;;  %v966_v38 = vrot.slane %v964_v22, 4 }
  0x74   : > { %v875_v0 = vrot.slane %v874_v51, 4  ;;  %v970_v51 = vor.u32 %v969_v39, %v966_v38  ;;  %v2213_v38 = vld [vmem:[%s2483_s25 + $0x4c] sm:$0xf] }
  0x77   : > { %734 = vrot.lane.b32.xlu1 %v2114_v42, %s2418_s28  ;;  %v859_v42 = vrot.slane %v857_v29, 4  ;;  %v929_v29 = vshrl.u32 %v2141_v14, 16 }
  0x78   : > { %732 = vrot.lane.b32.xlu0 %v2113_v43, %s2418_s28  ;;  %730 = vrot.lane.b32.xlu2 %v2112_v44, %s2418_s28  ;;  %v2138_v44 = vld [vmem:[%s2483_s25 + $0x34] sm:$0xf] }
  0x79   : > { %v860_v59 = vor.u32 %v859_v42, %v2717_v41  ;;  %v2147_v41 = vld [vmem:[%s2483_s25 + $0x58] sm:$0xf]  ;;  %v2142_v42 = vld [vmem:[%s2483_s25 + $0x44] sm:$0x1] }
  0x7b   : > { %v861_v8 = vrot.slane %v860_v59, 4  ;;  %v971_v59 = vrot.slane %v970_v51, 4 }
  0x7f   : > { %740 = vrot.lane.b32.xlu1 %v2117_v47, %s2418_s28 }
  0x80   : > { %738 = vrot.lane.b32.xlu0 %v2116_v48, %s2418_s28  ;;  %736 = vrot.lane.b32.xlu2 %v2115_v49, %s2418_s28  ;;  %v2133_v48 = vld [vmem:[%s2483_s25 + $0x20] sm:$0x1]  ;;  %v223_v49 = vld [vmem:[%s2483_s25 + $0x58] sm:$0xf] }
  0x81   : > { %v863_v60 = vshll.u32 %v2133_v48, 16  ;;  %240 = vst.msk [vmem:[#allocation2 + $0x3c] sm:$0xf] %vm224_vm6, %v223_v49 }
  0x82   : > { %v469_v53 = vpop.permute.xlu2 %468 }
  0x83   : > { %513 = vst.msk [vmem:[#allocation2 + $0x10] sm:$0xf] %vm508_vm7, %v469_v53  ;;  %v865_v9 = vrot.slane %v863_v60, 5 }
  0x87   : > { %746 = vrot.lane.b32.xlu1 %v2120_v54, %s2418_s28  ;;  %v901_v54 = vshll.u32 %v2138_v44, 16 }
  0x88   : > { %744 = vrot.lane.b32.xlu0 %v2119_v55, %s2418_s28  ;;  %742 = vrot.lane.b32.xlu2 %v2118_v56, %s2418_s28  ;;  %v905_v55 = vshrl.u32 %v2138_v44, 16  ;;  %v892_v56 = vshrl.u32 %v2137_v45, 16  ;;  %v931_v44 = vrot.slane %v929_v29, 4 }
  0x89   : > { %v2738_v3 = vrot.slane %v901_v54, 5 }
  0x8a   : > { %v471_v62 = vpop.permute.xlu2 %470 }
  0x8b   : > { %514 = vst.msk [vmem:[#allocation2 + $0x14] sm:$0xf] %vm508_vm7, %v471_v62  ;;  %v881_v62 = vshrl.u32 %v2135_v40, 16 }
  0x8d   : > { %v883_v15 = vrot.slane %v881_v62, 4 }
  0x8f   : > { %752 = vrot.lane.b32.xlu1 %v2123_v1, %s2418_s28  ;;  %v879_v1 = vrot.slane %v877_v52, 5  ;;  %v973_v52 = vshll.u32 %v2147_v41, 16 }
  0x90   : > { %750 = vrot.lane.b32.xlu0 %v2122_v4, %s2418_s28  ;;  %748 = vrot.lane.b32.xlu2 %v2121_v5, %s2418_s28  ;;  %v907_v4 = vrot.slane %v905_v55, 4  ;;  %v894_v5 = vrot.slane %v892_v56, 4  ;;  %v935_v55 = vshll.u32 %v2142_v42, 16  ;;  %v977_v56 = vshrl.u32 %v2147_v41, 16  ;;  %v2192_v41 = vld [vmem:[%s2483_s25 + $0x48] sm:$0xf] }
  0x91   : > { %v465_v13 = vpop.permute.xlu1 %464  ;;  %v975_v60 = vrot.slane %v973_v52, 5  ;;  %v2219_v52 = vld [vmem:[%s2483_s25 + $0x64] sm:$0xf] }
  0x92   : > { %511 = vst.msk [vmem:[#allocation2 + $0x8] sm:$0xf] %vm508_vm7, %v465_v13  ;;  %v461_v16 = vpop.permute.xlu0 %460  ;;  %v477_v20 = vpop.permute.xlu2 %476  ;;  %v911_v13 = vshll.u32 %v2139_v2, 16  ;;  %v898_v21 = vor.u32 %v897_v6, %v894_v5  ;;  %v2148_v5 = vld [vmem:[%s2483_s25 + $0x5c] sm:$0x1] }
  0x93   : > { %509 = vst.msk [vmem:[#allocation2] sm:$0xf] %vm508_vm7, %v461_v16  ;;  %v880_v16 = vsel %vm2494_vm2, %v875_v0, %v879_v1  ;;  %v2165_v0 = vld [vmem:[%s2483_s25 + $0x40] sm:$0xf]  ;;  %v976_v6 = vsel %vm2494_vm2, %v971_v59, %v975_v60 }
  0x94   : > { %517 = vst.msk [vmem:[#allocation2 + $0x20] sm:$0xf] %vm508_vm7, %v477_v20  ;;  %v908_v20 = vor.u32 %v907_v4, %v2738_v3  ;;  %v913_v34 = vrot.slane %v911_v13, 5  ;;  %v899_v36 = vrot.slane %v898_v21, 4  ;;  %v983_v13 = vshll.u32 %v2148_v5, 16 }
  0x96   : > { %v909_v35 = vrot.slane %v908_v20, 4  ;;  %v985_v21 = vrot.slane %v983_v13, 5 }
  0x97   : > { %758 = vrot.lane.b32.xlu1 %v2126_v24, %s2418_s28  ;;  %v866_v24 = vsel %vm2494_vm2, %v861_v8, %v865_v9  ;;  %v2166_v9 = vld [vmem:[%s2483_s25 + $0x44] sm:$0x1] }
  0x98   : > { %756 = vrot.lane.b32.xlu0 %v2125_v30, %s2418_s28  ;;  %754 = vrot.lane.b32.xlu2 %v2124_v33, %s2418_s28  ;;  %v884_v30 = vor.u32 %v883_v15, %v879_v1  ;;  %v919_v33 = vshll.u32 %v2140_v19, 16  ;;  %v1157_v15 = vrot.slane %v2166_v9, 5  ;;  %v2171_v19 = vld [vmem:[%s2483_s25 + $0x58] sm:$0xf] }
  0x99   : > { %v467_v43 = vpop.permute.xlu1 %466 }
  0x9a   : > { %512 = vst.msk [vmem:[#allocation2 + $0xc] sm:$0xf] %vm508_vm7, %v467_v43  ;;  %v463_v47 = vpop.permute.xlu0 %462  ;;  %v483_v53 = vpop.permute.xlu2 %482  ;;  %v927_v43 = vrot.slane %v925_v28, 5  ;;  %v885_v37 = vrot.slane %v884_v30, 4  ;;  %v921_v48 = vrot.slane %v919_v33, 5 }
  0x9b   : > { %510 = vst.msk [vmem:[#allocation2 + $0x4] sm:$0xf] %vm508_vm7, %v463_v47  ;;  %v918_v47 = vrot.slane %v916_v32, 4  ;;  %v2172_v28 = vld [vmem:[%s2483_s25 + $0x5c] sm:$0x1] }
  0x9c   : > { %520 = vst.msk [vmem:[#allocation2 + $0x2c] sm:$0xf] %vm508_vm7, %v483_v53  ;;  %v904_v53 = vsel %vm2494_vm2, %v899_v36, %v2738_v3  ;;  %v932_v54 = vor.u32 %v931_v44, %v927_v43  ;;  %v890_v57 = vsel %vm2494_vm2, %v885_v37, %v889_v46  ;;  %v979_v3 = vrot.slane %v977_v56, 4  ;;  %v2170_v30 = vld [vmem:[%s2483_s25 + $0x54] sm:$0xe] }
  0x9d   : > { %v1171_v33 = vrot.slane %v2172_v28, 5  ;;  %v2182_v36 = vrot.slane %v2170_v30, 9  ;;  %v1477_v37 = vshrl.u32 %v2213_v38, 16  ;;  %v2214_v56 = vld [vmem:[%s2483_s25 + $0x50] sm:$0x1] }
  0x9e   : > { %v933_v62 = vrot.slane %v932_v54, 4 }
  0x9f   : > { %1013 = vrot.lane.b32.xlu1 %v842_v50, %s2419_s29  ;;  %v914_v50 = vsel %vm2494_vm2, %v909_v35, %v913_v34  ;;  %v2218_v34 = vld [vmem:[%s2483_s25 + $0x60] sm:$0xf]  ;;  %v1479_v54 = vrot.slane %v1477_v37, 4 }
  0xa0   : > { %1011 = vrot.lane.b32.xlu0 %v832_v58, %s2419_s29  ;;  %760 = vrot.lane.b32.xlu2 %v2127_v63, %s2418_s28  ;;  %v922_v58 = vor.u32 %v921_v48, %v918_v47  ;;  %v937_v63 = vrot.slane %v935_v55, 5  ;;  %v1512_v42 = vshrl.u32 %v2218_v34, 16 }
  0xa1   : > { %v475_v7 = vpop.permute.xlu1 %474 }
  0xa2   : > { %516 = vst.msk [vmem:[#allocation2 + $0x1c] sm:$0xf] %vm508_vm7, %v475_v7  ;;  %v473_v12 = vpop.permute.xlu0 %472  ;;  %v489_v17 = vpop.permute.xlu2 %488  ;;  %v923_v2 = vrot.slane %v922_v58, 4  ;;  %v1154_v7 = vrot.slane %v2165_v0, 5  ;;  %v938_v8 = vsel %vm2494_vm2, %v933_v62, %v937_v63  ;;  %v1521_v62 = vshll.u32 %v2219_v52, 16 }
  0xa3   : > { %515 = vst.msk [vmem:[#allocation2 + $0x18] sm:$0xf] %vm508_vm7, %v473_v12  ;;  %v980_v12 = vor.u32 %v979_v3, %v975_v60  ;;  %v2197_v60 = vld [vmem:[%s2483_s25 + $0x64] sm:$0xf]  ;;  %v2196_v63 = vld [vmem:[%s2483_s25 + $0x60] sm:$0xf] }
  0xa4   : > { %523 = vst.msk [vmem:[#allocation2 + $0x38] sm:$0xf] %vm508_vm7, %v489_v17  ;;  %v928_v11 = vsel %vm2494_vm2, %v923_v2, %v927_v43  ;;  %v1156_v14 = vrot.slane %v1154_v7, 4  ;;  %v2180_v17 = vrot.slane %v2164_v10, 9  ;;  %v1515_v43 = vshll.u32 %v2218_v34, 16 }
  0xa5   : > { %v981_v20 = vrot.slane %v980_v12, 4  ;;  %v1525_v2 = vshrl.u32 %v2219_v52, 16  ;;  %v2193_v3 = vld [vmem:[%s2483_s25 + $0x4c] sm:$0xf] }
  0xa6   : > { %v1158_v23 = vsel %vm2562_vm5, %v1156_v14, %v1157_v15  ;;  %v2237_v10 = vld [vmem:[%s2483_s25 + $0x4c] sm:$0xf]  ;;  %v2220_v15 = vld [vmem:[%s2483_s25 + $0x68] sm:$0x1] }
  0xa7   : > { %1019 = vrot.lane.b32.xlu1 %v880_v16, %s2419_s29  ;;  %v986_v29 = vsel %vm2494_vm2, %v981_v20, %v985_v21  ;;  %v1527_v13 = vrot.slane %v1525_v2, 4  ;;  %v2236_v20 = vld [vmem:[%s2483_s25 + $0x48] sm:$0xe] }
  0xa8   : > { %1017 = vrot.lane.b32.xlu0 %v866_v24, %s2419_s29  ;;  %1015 = vrot.lane.b32.xlu2 %v856_v27, %s2419_s29  ;;  %v1155_v24 = vsel %vm2562_vm5, %v2180_v17, %v1154_v7  ;;  %v1168_v27 = vrot.slane %v2171_v19, 5  ;;  %v1702_v17 = vrot.slane %v2237_v10, 5  ;;  %v2238_v19 = vld [vmem:[%s2483_s25 + $0x50] sm:$0x1] }
  0xa9   : > { %v481_v40 = vpop.permute.xlu1 %480 }
  0xaa   : > { %519 = vst.msk [vmem:[#allocation2 + $0x28] sm:$0xf] %vm508_vm7, %v481_v40  ;;  %v479_v45 = vpop.permute.xlu0 %478  ;;  %v635_v49 = vpop.permute.xlu2 %634  ;;  %v1170_v32 = vrot.slane %v1168_v27, 4  ;;  %v2212_v40 = vld [vmem:[%s2483_s25 + $0x48] sm:$0xf]  ;;  %v1169_v46 = vsel %vm2562_vm5, %v2182_v36, %v1168_v27  ;;  %v1705_v27 = vrot.slane %v2238_v19, 5 }
  0xab   : > { %518 = vst.msk [vmem:[#allocation2 + $0x24] sm:$0xf] %vm508_vm7, %v479_v45  ;;  %v1473_v45 = vshll.u32 %v2213_v38, 16  ;;  %v1464_v47 = vshrl.u32 %v2212_v40, 16  ;;  %v1467_v48 = vshll.u32 %v2212_v40, 16 }
  0xac   : > { %682 = vst.msk [vmem:[#allocation2 + $0x4] sm:$0xf] %vm680_vm8, %v635_v49  ;;  %v1172_v44 = vsel %vm2562_vm5, %v1170_v32, %v1171_v33  ;;  %v1514_v49 = vrot.slane %v1512_v42, 4  ;;  %v2152_v38 = vld [vmem:[%s2483_s25 + $0xc] sm:$0xe] }
  0xad   : > { %v1469_v58 = vrot.slane %v1467_v48, 5  ;;  %v2159_v48 = vld [vmem:[%s2483_s25 + $0x28] sm:$0xf]  ;;  %v2207_v19 = vld [vmem:[%s2483_s25 + $0x34] sm:$0xf] }
  0xaf   : > { %1025 = vrot.lane.b32.xlu1 %v914_v50, %s2419_s29  ;;  %v1517_v50 = vrot.slane %v1515_v43, 5  ;;  %v2242_v43 = vld [vmem:[%s2483_s25 + $0x60] sm:$0xe] }
  0xb0   : > { %1023 = vrot.lane.b32.xlu0 %v904_v53, %s2419_s29  ;;  %1021 = vrot.lane.b32.xlu2 %v890_v57, %s2419_s29  ;;  %v1475_v53 = vrot.slane %v1473_v45, 5  ;;  %v1466_v57 = vrot.slane %v1464_v47, 4 }
  0xb1   : > { %v487_v61 = vpop.permute.xlu1 %486 }
  0xb2   : > { %522 = vst.msk [vmem:[#allocation2 + $0x34] sm:$0xf] %vm508_vm7, %v487_v61  ;;  %v485_v1 = vpop.permute.xlu0 %484  ;;  %v641_v4 = vpop.permute.xlu2 %640  ;;  %v1518_v61 = vor.u32 %v1517_v50, %v1514_v49  ;;  %v1480_v0 = vor.u32 %v1479_v54, %v1475_v53  ;;  %v2254_v50 = vrot.slane %v2242_v43, 9 }
  0xb3   : > { %521 = vst.msk [vmem:[#allocation2 + $0x30] sm:$0xf] %vm508_vm7, %v485_v1  ;;  %v1483_v1 = vshll.u32 %v2214_v56, 16  ;;  %v2158_v56 = vld [vmem:[%s2483_s25 + $0x24] sm:$0xe] }
  0xb4   : > { %685 = vst.msk [vmem:[#allocation2 + $0x10] sm:$0xf] %vm680_vm8, %v641_v4  ;;  %v1470_v4 = vor.u32 %v1469_v58, %v1466_v57  ;;  %v1519_v5 = vrot.slane %v1518_v61, 4  ;;  %v2154_v58 = vld [vmem:[%s2483_s25 + $0x14] sm:$0x1] }
  0xb5   : > { %v1485_v9 = vrot.slane %v1483_v1, 5  ;;  %v1129_v2 = vrot.slane %v2154_v58, 5  ;;  %v2231_v58 = vld [vmem:[%s2483_s25 + $0x34] sm:$0xf] }
  0xb6   : > { %v1471_v12 = vrot.slane %v1470_v4, 4 }
  0xb7   : > { %1035 = vrot.lane.b32.xlu1 %v976_v6, %s2419_s29  ;;  %v1523_v6 = vrot.slane %v1521_v62, 5  ;;  %v2178_v62 = vrot.slane %v2158_v56, 9 }
  0xb8   : > { %1029 = vrot.lane.b32.xlu0 %v938_v8, %s2419_s29  ;;  %1027 = vrot.lane.b32.xlu2 %v928_v11, %s2419_s29  ;;  %v1481_v8 = vrot.slane %v1480_v0, 4  ;;  %v1476_v21 = vsel %vm2494_vm2, %v1471_v12, %v1475_v53  ;;  %v1140_v53 = vrot.slane %v2159_v48, 5  ;;  %v2225_v48 = vld [vmem:[%s2483_s25 + $0x1c] sm:$0xf] }
  0xb9   : > { %v633_v16 = vpop.permute.xlu1 %632 }
  0xba   : > { %681 = vst.msk [vmem:[#allocation2] sm:$0xf] %vm680_vm8, %v633_v16  ;;  %v491_v18 = vpop.permute.xlu0 %490  ;;  %v647_v22 = vpop.permute.xlu2 %646  ;;  %v1524_v16 = vsel %vm2494_vm2, %v1519_v5, %v1523_v6 }
  0xbb   : > { %524 = vst.msk [vmem:[#allocation2 + $0x3c] sm:$0xf] %vm508_vm7, %v491_v18  ;;  %v1486_v18 = vsel %vm2494_vm2, %v1481_v8, %v1485_v9  ;;  %v1141_v8 = vsel %vm2562_vm5, %v2178_v62, %v1140_v53 }
  0xbc   : > { %688 = vst.msk [vmem:[#allocation2 + $0x1c] sm:$0xf] %vm680_vm8, %v647_v22  ;;  %v1528_v22 = vor.u32 %v1527_v13, %v1523_v6 }
  0xbe   : > { %v1529_v32 = vrot.slane %v1528_v22, 4  ;;  %v2188_v22 = vld [vmem:[%s2483_s25 + $0x30] sm:$0xf] }
  0xbf   : > { %1198 = vrot.lane.b32.xlu1 %v1158_v23, %s2420_s30  ;;  %v1531_v23 = vshll.u32 %v2220_v15, 16  ;;  %v2202_v15 = vld [vmem:[%s2483_s25 + $0x20] sm:$0x1] }
  0xc0   : > { %1196 = vrot.lane.b32.xlu0 %v1155_v24, %s2420_s30  ;;  %1037 = vrot.lane.b32.xlu2 %v986_v29, %s2419_s29  ;;  %v1704_v24 = vrot.slane %v1702_v17, 4  ;;  %v2252_v29 = vrot.slane %v2236_v20, 9 }
  0xc1   : > { %v639_v31 = vpop.permute.xlu1 %638  ;;  %v1533_v33 = vrot.slane %v1531_v23, 5 }
  0xc2   : > { %684 = vst.msk [vmem:[#allocation2 + $0xc] sm:$0xf] %vm680_vm8, %v639_v31  ;;  %v637_v35 = vpop.permute.xlu0 %636  ;;  %v653_v39 = vpop.permute.xlu2 %652  ;;  %v2243_v31 = vld [vmem:[%s2483_s25 + $0x64] sm:$0xf]  ;;  %v1703_v36 = vsel %vm2562_vm5, %v2252_v29, %v1702_v17  ;;  %v1425_v29 = vshll.u32 %v2207_v19, 16 }
  0xc3   : > { %683 = vst.msk [vmem:[#allocation2 + $0x8] sm:$0xf] %vm680_vm8, %v637_v35  ;;  %v1706_v35 = vsel %vm2562_vm5, %v1704_v24, %v1705_v27  ;;  %v1716_v40 = vrot.slane %v2243_v31, 5  ;;  %v1534_v42 = vsel %vm2494_vm2, %v1529_v32, %v1533_v33  ;;  %v1387_v24 = vshll.u32 %v2202_v15, 16  ;;  %v2185_v27 = vld [vmem:[%s2483_s25 + $0x1c] sm:$0xf] }
  0xc4   : > { %691 = vst.msk [vmem:[#allocation2 + $0x28] sm:$0xf] %vm680_vm8, %v653_v39  ;;  %v2153_v39 = vld [vmem:[%s2483_s25 + $0x10] sm:$0xf]  ;;  %v2184_v31 = vld [vmem:[%s2483_s25 + $0x18] sm:$0xf] }
  0xc5   : > { %v1126_v45 = vrot.slane %v2153_v39, 5  ;;  %v1717_v57 = vsel %vm2562_vm5, %v2254_v50, %v1716_v40  ;;  %v1427_v39 = vrot.slane %v1425_v29, 5 }
  0xc7   : > { %1294 = vrot.lane.b32.xlu1 %v2192_v41, %s2421_s4  ;;  %v2244_v41 = vld [vmem:[%s2483_s25 + $0x68] sm:$0x1]  ;;  %v1128_v1 = vrot.slane %v1126_v45, 4 }
  0xc8   : > { %1206 = vrot.lane.b32.xlu0 %v1172_v44, %s2420_s30  ;;  %1204 = vrot.lane.b32.xlu2 %v1169_v46, %s2420_s30  ;;  %v2176_v44 = vrot.slane %v2152_v38, 9  ;;  %v1718_v46 = vrot.slane %v1716_v40, 4  ;;  %v1719_v47 = vrot.slane %v2244_v41, 5 }
  0xc9   : > { %v645_v51 = vpop.permute.xlu1 %644 }
  0xca   : > { %687 = vst.msk [vmem:[#allocation2 + $0x18] sm:$0xf] %vm680_vm8, %v645_v51  ;;  %v643_v55 = vpop.permute.xlu0 %642  ;;  %v659_v59 = vpop.permute.xlu2 %658  ;;  %v1127_v52 = vsel %vm2562_vm5, %v2176_v44, %v1126_v45  ;;  %v1720_v54 = vsel %vm2562_vm5, %v1718_v46, %v1719_v47  ;;  %v2224_v47 = vld [vmem:[%s2483_s25 + $0x18] sm:$0xe] }
  0xcb   : > { %686 = vst.msk [vmem:[#allocation2 + $0x14] sm:$0xf] %vm680_vm8, %v643_v55  ;;  %v2160_v55 = vld [vmem:[%s2483_s25 + $0x2c] sm:$0x1] }
  0xcc   : > { %694 = vst.msk [vmem:[#allocation2 + $0x34] sm:$0xf] %vm680_vm8, %v659_v59  ;;  %v1142_v59 = vrot.slane %v1140_v53, 4  ;;  %v2248_v53 = vrot.slane %v2224_v47, 9 }
  0xcf   : > { %1304 = vrot.lane.b32.xlu1 %v2197_v60, %s2421_s4  ;;  %v1143_v60 = vrot.slane %v2160_v55, 5 }
  0xd0   : > { %1302 = vrot.lane.b32.xlu0 %v2196_v63, %s2421_s4  ;;  %1296 = vrot.lane.b32.xlu2 %v2193_v3, %s2421_s4  ;;  %v2201_v63 = vld [vmem:[%s2483_s25 + $0x1c] sm:$0xf]  ;;  %v2200_v3 = vld [vmem:[%s2483_s25 + $0x18] sm:$0xf] }
  0xd1   : > { %v651_v7 = vpop.permute.xlu1 %650  ;;  %v1144_v5 = vsel %vm2562_vm5, %v1142_v59, %v1143_v60  ;;  %v1377_v6 = vshll.u32 %v2201_v63, 16  ;;  %v1368_v9 = vshrl.u32 %v2200_v3, 16  ;;  %v1371_v10 = vshll.u32 %v2200_v3, 16  ;;  %v2149_v59 = vld [vmem:[%s2483_s25 + $0x60] sm:$0xf] }
  0xd2   : > { %690 = vst.msk [vmem:[#allocation2 + $0x24] sm:$0xf] %vm680_vm8, %v651_v7  ;;  %v649_v11 = vpop.permute.xlu0 %648  ;;  %v731_v14 = vpop.permute.xlu2 %730  ;;  %v1381_v7 = vshrl.u32 %v2201_v63, 16  ;;  %v2144_v63 = vld [vmem:[%s2483_s25 + $0x4c] sm:$0xf]  ;;  %v1688_v3 = vrot.slane %v2231_v58, 5 }
  0xd3   : > { %689 = vst.msk [vmem:[#allocation2 + $0x20] sm:$0xf] %vm680_vm8, %v649_v11  ;;  %v1130_v11 = vsel %vm2562_vm5, %v1128_v1, %v1129_v2  ;;  %v1379_v12 = vrot.slane %v1377_v6, 5  ;;  %v1373_v17 = vrot.slane %v1371_v10, 5  ;;  %v2143_v1 = vld [vmem:[%s2483_s25 + $0x48] sm:$0xf] }
  0xd4   : > { %779 = vst.msk [vmem:[#allocation2] sm:$0xf] %vm778_vm9, %v731_v14  ;;  %v1383_v13 = vrot.slane %v1381_v7, 4  ;;  %v2230_v7 = vld [vmem:[%s2483_s25 + $0x30] sm:$0xe]  ;;  %v1690_v15 = vrot.slane %v1688_v3, 4 }
  0xd6   : > { %v1384_v23 = vor.u32 %v1383_v13, %v1379_v12 }
  0xd7   : > { %1583 = vrot.lane.b32.xlu1 %v1524_v16, %s2422_s5  ;;  %v1370_v16 = vrot.slane %v1368_v9, 4  ;;  %v953_v9 = vshrl.u32 %v2144_v63, 16 }
  0xd8   : > { %1577 = vrot.lane.b32.xlu0 %v1486_v18, %s2422_s5  ;;  %1575 = vrot.lane.b32.xlu2 %v1476_v21, %s2422_s5  ;;  %v2206_v21 = vld [vmem:[%s2483_s25 + $0x30] sm:$0xf] }
  0xd9   : > { %v657_v28 = vpop.permute.xlu1 %656  ;;  %v1416_v32 = vshrl.u32 %v2206_v21, 16  ;;  %v1419_v33 = vshll.u32 %v2206_v21, 16  ;;  %v2145_v21 = vld [vmem:[%s2483_s25 + $0x50] sm:$0x1] }
  0xda   : > { %693 = vst.msk [vmem:[#allocation2 + $0x30] sm:$0xf] %vm680_vm8, %v657_v28  ;;  %v655_v30 = vpop.permute.xlu0 %654  ;;  %v737_v34 = vpop.permute.xlu2 %736  ;;  %v1374_v28 = vor.u32 %v1373_v17, %v1370_v16  ;;  %v2250_v16 = vrot.slane %v2230_v7, 9 }
  0xdb   : > { %692 = vst.msk [vmem:[#allocation2 + $0x2c] sm:$0xf] %vm680_vm8, %v655_v30  ;;  %v1429_v30 = vshrl.u32 %v2207_v19, 16  ;;  %v1418_v43 = vrot.slane %v1416_v32, 4  ;;  %v1421_v44 = vrot.slane %v1419_v33, 5 }
  0xdc   : > { %782 = vst.msk [vmem:[#allocation2 + $0xc] sm:$0xf] %vm778_vm9, %v737_v34  ;;  %v1385_v34 = vrot.slane %v1384_v23, 4  ;;  %v1375_v38 = vrot.slane %v1374_v28, 4  ;;  %v955_v23 = vrot.slane %v953_v9, 4 }
  0xdd   : > { %v1431_v40 = vrot.slane %v1429_v30, 4 }
  0xde   : > { %v1380_v46 = vsel %vm2494_vm2, %v1375_v38, %v1379_v12  ;;  %v943_v12 = vshll.u32 %v2143_v1, 16  ;;  %v959_v38 = vshll.u32 %v2145_v21, 16 }
  0xdf   : > { %1746 = vrot.lane.b32.xlu1 %v1706_v35, %s2423_s6  ;;  %v1389_v35 = vrot.slane %v1387_v24, 5 }
  0xe0   : > { %1744 = vrot.lane.b32.xlu0 %v1703_v36, %s2423_s6  ;;  %1585 = vrot.lane.b32.xlu2 %v1534_v42, %s2422_s5  ;;  %v2208_v42 = vld [vmem:[%s2483_s25 + $0x38] sm:$0x1]  ;;  %v945_v30 = vrot.slane %v943_v12, 5 }
  0xe1   : > { %v663_v37 = vpop.permute.xlu1 %662  ;;  %v1435_v50 = vshll.u32 %v2208_v42, 16 }
  0xe2   : > { %696 = vst.msk [vmem:[#allocation2 + $0x3c] sm:$0xf] %vm680_vm8, %v663_v37  ;;  %v661_v49 = vpop.permute.xlu0 %660  ;;  %v743_v51 = vpop.permute.xlu2 %742  ;;  %v1390_v37 = vsel %vm2494_vm2, %v1385_v34, %v1389_v35  ;;  %v1689_v35 = vsel %vm2562_vm5, %v2250_v16, %v1688_v3 }
  0xe3   : > { %695 = vst.msk [vmem:[#allocation2 + $0x38] sm:$0xf] %vm680_vm8, %v661_v49  ;;  %v1432_v49 = vor.u32 %v1431_v40, %v1427_v39 }
  0xe4   : > { %785 = vst.msk [vmem:[#allocation2 + $0x18] sm:$0xf] %vm778_vm9, %v743_v51  ;;  %v2189_v51 = vld [vmem:[%s2483_s25 + $0x34] sm:$0xf] }
  0xe5   : > { %v1433_v56 = vrot.slane %v1432_v49, 4 }
  0xe7   : > { %1180 = vrot.lane.b32.xlu1 %v1127_v52, %s2420_s30  ;;  %v1422_v52 = vor.u32 %v1421_v44, %v1418_v43 }
  0xe8   : > { %1754 = vrot.lane.b32.xlu0 %v1720_v54, %s2423_s6  ;;  %1752 = vrot.lane.b32.xlu2 %v1717_v57, %s2423_s6  ;;  %v1674_v54 = vrot.slane %v2225_v48, 5  ;;  %v1437_v57 = vrot.slane %v1435_v50, 5 }
  0xe9   : > { %v735_v61 = vpop.permute.xlu1 %734  ;;  %v1423_v62 = vrot.slane %v1422_v52, 4 }
  0xea   : > { %781 = vst.msk [vmem:[#allocation2 + $0x8] sm:$0xf] %vm778_vm9, %v735_v61  ;;  %v733_v0 = vpop.permute.xlu0 %732  ;;  %v749_v4 = vpop.permute.xlu2 %748  ;;  %v2232_v61 = vld [vmem:[%s2483_s25 + $0x38] sm:$0x1]  ;;  %v1675_v2 = vsel %vm2562_vm5, %v2248_v53, %v1674_v54  ;;  %v1438_v6 = vsel %vm2494_vm2, %v1433_v56, %v1437_v57  ;;  %v2167_v56 = vld [vmem:[%s2483_s25 + $0x48] sm:$0xe] }
  0xeb   : > { %780 = vst.msk [vmem:[#allocation2 + $0x4] sm:$0xf] %vm778_vm9, %v733_v0  ;;  %v1428_v10 = vsel %vm2494_vm2, %v1423_v62, %v1427_v39  ;;  %v1691_v13 = vrot.slane %v2232_v61, 5 }
  0xec   : > { %788 = vst.msk [vmem:[#allocation2 + $0x24] sm:$0xf] %vm778_vm9, %v749_v4  ;;  %v988_v4 = vshrl.u32 %v2149_v59, 16 }
  0xed   : > { %v1692_v32 = vsel %vm2562_vm5, %v1690_v15, %v1691_v13 }
  0xee   : > { %v990_v17 = vrot.slane %v988_v4, 4 }
  0xef   : > { %1190 = vrot.lane.b32.xlu1 %v1144_v5, %s2420_s30  ;;  %v991_v5 = vshll.u32 %v2149_v59, 16 }
  0xf0   : > { %1188 = vrot.lane.b32.xlu0 %v1141_v8, %s2420_s30  ;;  %1182 = vrot.lane.b32.xlu2 %v1130_v11, %s2420_s30  ;;  %v949_v8 = vshll.u32 %v2144_v63, 16  ;;  %v940_v11 = vshrl.u32 %v2143_v1, 16  ;;  %v2181_v63 = vrot.slane %v2167_v56, 9  ;;  %v2174_v1 = vld [vmem:[%s2483_s25 + $0x64] sm:$0xf] }
  0xf1   : > { %v741_v14 = vpop.permute.xlu1 %740  ;;  %v1175_v7 = vrot.slane %v2174_v1, 5  ;;  %v2223_v1 = vld [vmem:[%s2483_s25 + $0x74] sm:$0x1] }
  0xf2   : > { %784 = vst.msk [vmem:[#allocation2 + $0x14] sm:$0xf] %vm778_vm9, %v741_v14  ;;  %v739_v18 = vpop.permute.xlu0 %738  ;;  %v755_v20 = vpop.permute.xlu2 %754  ;;  %v2226_v14 = vld [vmem:[%s2483_s25 + $0x20] sm:$0x1]  ;;  %v942_v29 = vrot.slane %v940_v11, 4 }
  0xf3   : > { %783 = vst.msk [vmem:[#allocation2 + $0x10] sm:$0xf] %vm778_vm9, %v739_v18  ;;  %v993_v18 = vrot.slane %v991_v5, 5  ;;  %v1677_v28 = vrot.slane %v2226_v14, 5  ;;  %v1177_v12 = vrot.slane %v1175_v7, 4 }
  0xf4   : > { %791 = vst.msk [vmem:[#allocation2 + $0x30] sm:$0xf] %vm778_vm9, %v755_v20  ;;  %v2150_v20 = vld [vmem:[%s2483_s25 + $0x64] sm:$0xf]  ;;  %v2221_v14 = vld [vmem:[%s2483_s25 + $0x6c] sm:$0xf] }
  0xf5   : > { %v994_v33 = vor.u32 %v993_v18, %v990_v17  ;;  %v997_v34 = vshll.u32 %v2150_v20, 16  ;;  %v1001_v39 = vshrl.u32 %v2150_v20, 16  ;;  %v2216_v17 = vld [vmem:[%s2483_s25 + $0x58] sm:$0xf]  ;;  %v2194_v20 = vld [vmem:[%s2483_s25 + $0x54] sm:$0xf] }
  0xf6   : > { %v1536_v21 = vshrl.u32 %v2221_v14, 16 }
  0xf7   : > { %1286 = vrot.lane.b32.xlu1 %v2188_v22, %s2421_s4  ;;  %v951_v22 = vrot.slane %v949_v8, 5  ;;  %v995_v42 = vrot.slane %v994_v33, 4  ;;  %v999_v43 = vrot.slane %v997_v34, 5  ;;  %v1003_v49 = vrot.slane %v1001_v39, 4  ;;  %v2175_v8 = vld [vmem:[%s2483_s25 + $0x68] sm:$0x1] }
  0xf8   : > { %1280 = vrot.lane.b32.xlu0 %v2185_v27, %s2421_s4  ;;  %1278 = vrot.lane.b32.xlu2 %v2184_v31, %s2421_s4  ;;  %v1676_v27 = vrot.slane %v1674_v54, 4  ;;  %v1178_v13 = vrot.slane %v2175_v8, 5  ;;  %v2222_v34 = vld [vmem:[%s2483_s25 + $0x70] sm:$0xf]  ;;  %v2217_v39 = vld [vmem:[%s2483_s25 + $0x5c] sm:$0x1] }
  0xf9   : > { %v747_v36 = vpop.permute.xlu1 %746  ;;  %v1000_v52 = vsel %vm2494_vm2, %v995_v42, %v999_v43  ;;  %v1004_v58 = vor.u32 %v1003_v49, %v999_v43  ;;  %v2199_v43 = vld [vmem:[%s2483_s25 + $0x70] sm:$0xf]  ;;  %v1549_v49 = vshrl.u32 %v2222_v34, 16 }
  0xfa   : > { %787 = vst.msk [vmem:[#allocation2 + $0x20] sm:$0xf] %vm778_vm9, %v747_v36  ;;  %v745_v41 = vpop.permute.xlu0 %744  ;;  %v761_v45 = vpop.permute.xlu2 %760  ;;  %v956_v36 = vor.u32 %v955_v23, %v951_v22  ;;  %v1678_v40 = vsel %vm2562_vm5, %v1676_v27, %v1677_v28  ;;  %v1179_v23 = vsel %vm2562_vm5, %v1177_v12, %v1178_v13  ;;  %v1501_v27 = vshrl.u32 %v2216_v17, 16 }
  0xfb   : > { %786 = vst.msk [vmem:[#allocation2 + $0x1c] sm:$0xf] %vm778_vm9, %v745_v41  ;;  %v946_v41 = vor.u32 %v945_v30, %v942_v29 }
  0xfc   : > { %794 = vst.msk [vmem:[#allocation2 + $0x3c] sm:$0xf] %vm778_vm9, %v761_v45  ;;  %v957_v45 = vrot.slane %v956_v36, 4  ;;  %v1503_v36 = vrot.slane %v1501_v27, 4 }
  0xfd   : > { %v947_v48 = vrot.slane %v946_v41, 4 }
  0xff   : > { %1561 = vrot.lane.b32.xlu1 %v1390_v37, %s2422_s5  ;;  %v961_v37 = vrot.slane %v959_v38, 5  ;;  %v952_v57 = vsel %vm2494_vm2, %v947_v48, %v951_v22  ;;  %v1539_v22 = vshll.u32 %v2221_v14, 16  ;;  %v1813_v48 = vld [vmem:[%s3264_s1 + $0x10] sm:$0x3] }
 0x100   : > { %1559 = vrot.lane.b32.xlu0 %v1380_v46, %s2422_s5  ;;  %1288 = vrot.lane.b32.xlu2 %v2189_v51, %s2421_s4  ;;  %v2168_v46 = vld [vmem:[%s2483_s25 + $0x4c] sm:$0xf]  ;;  %v2151_v51 = vld [vmem:[%s2483_s25 + $0x68] sm:$0x1] }
 0x101   : > { %v753_v55 = vpop.permute.xlu1 %752  ;;  %v1161_v53 = vrot.slane %v2168_v46, 5  ;;  %v962_v54 = vsel %vm2494_vm2, %v957_v45, %v961_v37  ;;  %v1007_v59 = vshll.u32 %v2151_v51, 16  ;;  %v1545_v45 = vshll.u32 %v2222_v34, 16  ;;  %v2198_v37 = vld [vmem:[%s2483_s25 + $0x6c] sm:$0xf] }
 0x102   : > { %790 = vst.msk [vmem:[#allocation2 + $0x2c] sm:$0xf] %vm778_vm9, %v753_v55  ;;  %v751_v60 = vpop.permute.xlu0 %750  ;;  %v1016_v0 = vpop.permute.xlu2 %1015  ;;  %v2169_v55 = vld [vmem:[%s2483_s25 + $0x50] sm:$0x1] }
 0x103   : > { %789 = vst.msk [vmem:[#allocation2 + $0x28] sm:$0xf] %vm778_vm9, %v751_v60  ;;  %v1163_v60 = vrot.slane %v1161_v53, 4  ;;  %v1164_v61 = vrot.slane %v2169_v55, 5  ;;  %v1009_v3 = vrot.slane %v1007_v59, 5 }
 0x104   : > { %1062 = vst.msk [vmem:[#allocation2 + $0x8] sm:$0xf] %vm1059_vm10, %v1016_v0  ;;  %v2240_v59 = vld [vmem:[%s2483_s25 + $0x58] sm:$0xf] }
 0x105   : > { %v1165_v5 = vsel %vm2562_vm5, %v1163_v60, %v1164_v61 }
 0x107   : > { %1728 = vrot.lane.b32.xlu1 %v1675_v2, %s2423_s6  ;;  %v1005_v2 = vrot.slane %v1004_v58, 4 }
 0x108   : > { %1569 = vrot.lane.b32.xlu0 %v1438_v6, %s2422_s5  ;;  %1567 = vrot.lane.b32.xlu2 %v1428_v10, %s2422_s5  ;;  %v1162_v6 = vsel %vm2562_vm5, %v2181_v63, %v1161_v53  ;;  %v2173_v10 = vld [vmem:[%s2483_s25 + $0x60] sm:$0xe] }
 0x109   : > { %v759_v19 = vpop.permute.xlu1 %758  ;;  %v1010_v9 = vsel %vm2494_vm2, %v1005_v2, %v1009_v3  ;;  %v2183_v16 = vrot.slane %v2173_v10, 9  ;;  %v2315_v2 = vld [vmem:[%s3264_s1 + $0x8] sm:$0xff]  ;;  %v1555_v10 = vshll.u32 %v2223_v1, 16 }
 0x10a   : > { %793 = vst.msk [vmem:[#allocation2 + $0x38] sm:$0xf] %vm778_vm9, %v759_v19  ;;  %v757_v24 = vpop.permute.xlu0 %756  ;;  %v1022_v31 = vpop.permute.xlu2 %1021  ;;  %v2215_v19 = vld [vmem:[%s2483_s25 + $0x54] sm:$0xf] }
 0x10b   : > { %792 = vst.msk [vmem:[#allocation2 + $0x34] sm:$0xf] %vm778_vm9, %v757_v24  ;;  %v1497_v24 = vshll.u32 %v2216_v17, 16  ;;  %v1176_v28 = vsel %vm2562_vm5, %v2183_v16, %v1175_v7  ;;  %v1488_v29 = vshrl.u32 %v2215_v19, 16  ;;  %v1491_v30 = vshll.u32 %v2215_v19, 16 }
 0x10c   : > { %1065 = vst.msk [vmem:[#allocation2 + $0x14] sm:$0xf] %vm1059_vm10, %v1022_v31  ;;  %v1538_v31 = vrot.slane %v1536_v21, 4  ;;  %v2239_v7 = vld [vmem:[%s2483_s25 + $0x54] sm:$0xe]  ;;  %v1557_v19 = vrot.slane %v1555_v10, 5 }
 0x10d   : > { %v1493_v41 = vrot.slane %v1491_v30, 5  ;;  %v2246_v17 = vld [vmem:[%s2483_s25 + $0x70] sm:$0xf]  ;;  %v2245_v30 = vld [vmem:[%s2483_s25 + $0x6c] sm:$0xe] }
 0x10e   : > { %v1723_v27 = vrot.slane %v2246_v17, 5  ;;  %v2190_v10 = vld [vmem:[%s2483_s25 + $0x3c] sm:$0xf]  ;;  %v2186_v17 = vld [vmem:[%s2483_s25 + $0x24] sm:$0xf] }
 0x10f   : > { %1738 = vrot.lane.b32.xlu1 %v1692_v32, %s2423_s6  ;;  %v1541_v32 = vrot.slane %v1539_v22, 5 }
 0x110   : > { %1736 = vrot.lane.b32.xlu0 %v1689_v35, %s2423_s6  ;;  %1730 = vrot.lane.b32.xlu2 %v1678_v40, %s2423_s6  ;;  %v2997_v35 = vrot.slane %v1497_v24, 5  ;;  %v1490_v40 = vrot.slane %v1488_v29, 4  ;;  %v2156_v24 = vld [vmem:[%s2483_s25 + $0x1c] sm:$0xf]  ;;  %v1725_v34 = vrot.slane %v1723_v27, 4 }
 0x111   : > { %v1014_v44 = vpop.permute.xlu1 %1013 }
 0x112   : > { %1061 = vst.msk [vmem:[#allocation2 + $0x4] sm:$0xf] %vm1059_vm10, %v1014_v44  ;;  %v1012_v47 = vpop.permute.xlu0 %1011  ;;  %v1028_v50 = vpop.permute.xlu2 %1027  ;;  %v1542_v44 = vor.u32 %v1541_v32, %v1538_v31  ;;  %v1504_v46 = vor.u32 %v1503_v36, %v2997_v35  ;;  %v1494_v51 = vor.u32 %v1493_v41, %v1490_v40  ;;  %v1133_v32 = vrot.slane %v2156_v24, 5  ;;  %v2162_v36 = vld [vmem:[%s2483_s25 + $0x34] sm:$0xf] }
 0x113   : > { %1060 = vst.msk [vmem:[#allocation2] sm:$0xf] %vm1059_vm10, %v1012_v47  ;;  %v1507_v47 = vshll.u32 %v2217_v39, 16  ;;  %v2255_v39 = vrot.slane %v2245_v30, 9  ;;  %v2211_v24 = vld [vmem:[%s2483_s25 + $0x44] sm:$0x1] }
 0x114   : > { %1068 = vst.msk [vmem:[#allocation2 + $0x20] sm:$0xf] %vm1059_vm10, %v1028_v50  ;;  %v2195_v50 = vld [vmem:[%s2483_s25 + $0x58] sm:$0xf]  ;;  %v1543_v53 = vrot.slane %v1542_v44, 4  ;;  %v1495_v61 = vrot.slane %v1494_v51, 4 }
 0x115   : > { %v1509_v58 = vrot.slane %v1507_v47, 5  ;;  %v2163_v44 = vld [vmem:[%s2483_s25 + $0x38] sm:$0x1]  ;;  %v2204_v51 = vld [vmem:[%s2483_s25 + $0x28] sm:$0xf] }
 0x116   : > { %v1500_v8 = vsel %vm2494_vm2, %v1495_v61, %v2997_v35 }
 0x117   : > { %1039 = vrot.lane.b32.xlu1 %v1000_v52, %s2419_s29  ;;  %v1867_v52 = vunpack.c.l.b16 %v1813_v48  ;;  %v1150_v48 = vrot.slane %v2163_v44, 5 }
 0x118   : > { %1033 = vrot.lane.b32.xlu0 %v962_v54, %s2419_s29  ;;  %1031 = vrot.lane.b32.xlu2 %v952_v57, %s2419_s29  ;;  %v1547_v54 = vrot.slane %v1545_v45, 5  ;;  %v1505_v57 = vrot.slane %v1504_v46, 4  ;;  %v2161_v45 = vld [vmem:[%s2483_s25 + $0x30] sm:$0xe]  ;;  %v2157_v46 = vld [vmem:[%s2483_s25 + $0x20] sm:$0x1] }
 0x119   : > { %v1020_v62 = vpop.permute.xlu1 %1019  ;;  %v1870_v55 = vpack.c.b16 %v1867_v52, %v1867_v52 }
 0x11a   : > { %1064 = vst.msk [vmem:[#allocation2 + $0x10] sm:$0xf] %vm1059_vm10, %v1020_v62  ;;  %v1018_v0 = vpop.permute.xlu0 %1017  ;;  %v1038_v4 = vpop.permute.xlu2 %1037  ;;  %v1551_v62 = vrot.slane %v1549_v49, 4  ;;  %v1548_v3 = vsel %vm2494_vm2, %v1543_v53, %v1547_v54  ;;  %v1135_v53 = vrot.slane %v1133_v32, 4 }
 0x11b   : > { %1063 = vst.msk [vmem:[#allocation2 + $0xc] sm:$0xf] %vm1059_vm10, %v1018_v0  ;;  %v1900_v63 = vsel %vm1898_vm12, %v1870_v55, 0  ;;  %v2203_v55 = vld [vmem:[%s2483_s25 + $0x24] sm:$0xf] }
 0x11c   : > { %1073 = vst.msk [vmem:[#allocation2 + $0x34] sm:$0xf] %vm1059_vm10, %v1038_v4  ;;  %2317 = vmatpush.bf16.msra.mxu2 %v1900_v63  ;;  %2318 = vmatpush.bf16.msra.mxu3 %v1900_v63  ;;  %v1709_v4 = vrot.slane %v2240_v59, 5  ;;  %v1405_v59 = vshrl.u32 %v2204_v51, 16  ;;  %v1392_v61 = vshrl.u32 %v2203_v55, 16 }
 0x11d   : > { %1907 = vmatpush.bf16.msra.mxu0 %v1900_v63  ;;  %2316 = vmatpush.bf16.msra.mxu1 %v1900_v63 }
 0x11e   : > { %v1711_v12 = vrot.slane %v1709_v4, 4  ;;  %v1407_v1 = vrot.slane %v1405_v59, 4 }
 0x11f   : > { %1202 = vrot.lane.b32.xlu1 %v1165_v5, %s2420_s30  ;;  %v1510_v5 = vsel %vm2494_vm2, %v1505_v57, %v1509_v58  ;;  %v1401_v58 = vshll.u32 %v2204_v51, 16 }
 0x120   : > { %1200 = vrot.lane.b32.xlu0 %v1162_v6, %s2420_s30  ;;  %1041 = vrot.lane.b32.xlu2 %v1010_v9, %s2419_s29  ;;  %v2241_v6 = vld [vmem:[%s2483_s25 + $0x5c] sm:$0x1]  ;;  %v1552_v9 = vor.u32 %v1551_v62, %v1547_v54  ;;  %v1136_v54 = vrot.slane %v2157_v46, 5  ;;  %v1395_v62 = vshll.u32 %v2203_v55, 16  ;;  %v2235_v55 = vld [vmem:[%s2483_s25 + $0x44] sm:$0x1] }
 0x121   : > { %v1026_v11 = vpop.permute.xlu1 %1025  ;;  %2320 = vmatpush.bf16.msra.mxu2 %v2315_v2  ;;  %v1712_v13 = vrot.slane %v2241_v6, 5  ;;  %2321 = vmatpush.bf16.msra.mxu3 %v2315_v2 }
 0x122   : > { %1067 = vst.msk [vmem:[#allocation2 + $0x1c] sm:$0xf] %vm1059_vm10, %v1026_v11  ;;  %v1024_v15 = vpop.permute.xlu0 %1023  ;;  %v1205_v18 = vpop.permute.xlu2 %1204  ;;  %v2314_v11 = vld [vmem:[%s3264_s1] sm:$0xff]  ;;  %1908 = vmatpush.bf16.msra.mxu0 %v2315_v2  ;;  %2319 = vmatpush.bf16.msra.mxu1 %v2315_v2  ;;  %v1137_v63 = vsel %vm2562_vm5, %v1135_v53, %v1136_v54 }
 0x123   : > { %1066 = vst.msk [vmem:[#allocation2 + $0x18] sm:$0xf] %vm1059_vm10, %v1024_v15  ;;  %v2253_v15 = vrot.slane %v2239_v7, 9  ;;  %v1713_v21 = vsel %vm2562_vm5, %v1711_v12, %v1712_v13  ;;  %v2210_v7 = vld [vmem:[%s2483_s25 + $0x40] sm:$0xf] }
 0x124   : > { %v2187_v13 = vld [vmem:[%s2483_s25 + $0x28] sm:$0xf] }
 0x125   : > { %2323 = vmatpush.bf16.msra.mxu2 %v2314_v11  ;;  %2324 = vmatpush.bf16.msra.mxu3 %v2314_v11  ;;  %v1710_v22 = vsel %vm2562_vm5, %v2253_v15, %v1709_v4  ;;  %v1394_v4 = vrot.slane %v1392_v61, 4  ;;  %v1449_v15 = vshll.u32 %v2210_v7, 16 }
 0x126   : > { %1909 = vmatpush.bf16.msra.mxu0 %v2314_v11  ;;  %2322 = vmatpush.bf16.msra.mxu1 %v2314_v11 }
 0x127   : > { %1298 = vrot.lane.b32.xlu1 %v2194_v20, %s2421_s4 }
 0x128   : > { %1210 = vrot.lane.b32.xlu0 %v1179_v23, %s2420_s30  ;;  %1208 = vrot.lane.b32.xlu2 %v1176_v28, %s2420_s30  ;;  %v2155_v23 = vld [vmem:[%s2483_s25 + $0x18] sm:$0xe]  ;;  %v2247_v28 = vld [vmem:[%s2483_s25 + $0x74] sm:$0x1] }
 0x129   : > { %v1036_v33 = vpop.permute.xlu1 %1035  ;;  %v2177_v31 = vrot.slane %v2155_v23, 9  ;;  %v1726_v35 = vrot.slane %v2247_v28, 5 }
 0x12a   : > { %1072 = vst.msk [vmem:[#allocation2 + $0x30] sm:$0xf] %vm1059_vm10, %v1036_v33  ;;  %v1030_v38 = vpop.permute.xlu0 %1029  ;;  %v1297_v42 = vpop.permute.xlu2 %1296 }
 0x12b   : > { %1069 = vst.msk [vmem:[#allocation2 + $0x24] sm:$0xf] %vm1059_vm10, %v1030_v38  ;;  %v1134_v41 = vsel %vm2562_vm5, %v2177_v31, %v1133_v32 }
 0x12c   : > { %1241 = vst.msk [vmem:[#allocation2 + $0x30] sm:$0xf] %vm1228_vm11, %v1205_v18  ;;  %v1553_v18 = vrot.slane %v1552_v9, 4  ;;  %v2209_v9 = vld [vmem:[%s2483_s25 + $0x3c] sm:$0xf] }
 0x12e   : > { %v1558_v29 = vsel %vm2494_vm2, %v1553_v18, %v1557_v19  ;;  %v1440_v18 = vshrl.u32 %v2209_v9, 16  ;;  %v1443_v19 = vshll.u32 %v2209_v9, 16 }
 0x12f   : > { %1308 = vrot.lane.b32.xlu1 %v2199_v43, %s2421_s4  ;;  %v1727_v43 = vsel %vm2562_vm5, %v1725_v34, %v1726_v35 }
 0x130   : > { %1306 = vrot.lane.b32.xlu0 %v2198_v37, %s2421_s4  ;;  %1300 = vrot.lane.b32.xlu2 %v2195_v50, %s2421_s4  ;;  %v1724_v37 = vsel %vm2562_vm5, %v2255_v39, %v1723_v27  ;;  %v2179_v50 = vrot.slane %v2161_v45, 9  ;;  %v1451_v27 = vrot.slane %v1449_v15, 5  ;;  %v1442_v31 = vrot.slane %v1440_v18, 4 }
 0x131   : > { %v1199_v56 = vpop.permute.xlu1 %1198  ;;  %v1445_v32 = vrot.slane %v1443_v19, 5 }
 0x132   : > { %1238 = vst.msk [vmem:[#allocation2 + $0x24] sm:$0xf] %vm1228_vm11, %v1199_v56  ;;  %v1197_v60 = vpop.permute.xlu0 %1196  ;;  %v1576_v0 = vpop.permute.xlu2 %1575 }
 0x133   : > { %1237 = vst.msk [vmem:[#allocation2 + $0x20] sm:$0xf] %vm1228_vm11, %v1197_v60 }
 0x134   : > { %1336 = vst.msk [vmem:[#allocation2 + $0x24] sm:$0xf] %vm1326_vm13, %v1297_v42  ;;  %v1147_v42 = vrot.slane %v2162_v36, 5  ;;  %v2227_v36 = vld [vmem:[%s2483_s25 + $0x24] sm:$0xe] }
 0x136   : > { %v1149_v47 = vrot.slane %v1147_v42, 4  ;;  %v1148_v60 = vsel %vm2562_vm5, %v2179_v50, %v1147_v42  ;;  %v1446_v42 = vor.u32 %v1445_v32, %v1442_v31 }
 0x137   : > { %1587 = vrot.lane.b32.xlu1 %v1548_v3, %s2422_s5  ;;  %v2205_v3 = vld [vmem:[%s2483_s25 + $0x2c] sm:$0x1] }
 0x138   : > { %1581 = vrot.lane.b32.xlu0 %v1510_v5, %s2422_s5  ;;  %1579 = vrot.lane.b32.xlu2 %v1500_v8, %s2422_s5  ;;  %v1151_v57 = vsel %vm2562_vm5, %v1149_v47, %v1150_v48  ;;  %v1397_v5 = vrot.slane %v1395_v62, 5  ;;  %v1411_v12 = vshll.u32 %v2205_v3, 16  ;;  %v2234_v47 = vld [vmem:[%s2483_s25 + $0x40] sm:$0xf]  ;;  %v1447_v50 = vrot.slane %v1446_v42, 4 }
 0x139   : > { %v1295_v14 = vpop.permute.xlu1 %1294  ;;  %v1695_v53 = vrot.slane %v2234_v47, 5 }
 0x13a   : > { %1335 = vst.msk [vmem:[#allocation2 + $0x20] sm:$0xf] %vm1326_vm13, %v1295_v14  ;;  %v1207_v16 = vpop.permute.xlu0 %1206  ;;  %v1586_v20 = vpop.permute.xlu2 %1585  ;;  %v1398_v14 = vor.u32 %v1397_v5, %v1394_v4 }
 0x13b   : > { %1242 = vst.msk [vmem:[#allocation2 + $0x34] sm:$0xf] %vm1228_vm11, %v1207_v16  ;;  %v1453_v16 = vshrl.u32 %v2210_v7, 16  ;;  %v1697_v59 = vrot.slane %v1695_v53, 4 }
 0x13c   : > { %1616 = vst.msk [vmem:[#allocation2 + $0x20] sm:$0xf] %vm1607_vm14, %v1576_v0  ;;  %v1403_v0 = vrot.slane %v1401_v58, 5  ;;  %v1399_v23 = vrot.slane %v1398_v14, 4  ;;  %v2229_v58 = vld [vmem:[%s2483_s25 + $0x2c] sm:$0x1] }
 0x13d   : > { %v1455_v28 = vrot.slane %v1453_v16, 4 }
 0x13e   : > { %v1408_v11 = vor.u32 %v1407_v1, %v1403_v0  ;;  %v1404_v35 = vsel %vm2494_vm2, %v1399_v23, %v1403_v0  ;;  %v1684_v1 = vrot.slane %v2229_v58, 5 }
 0x13f   : > { %1750 = vrot.lane.b32.xlu1 %v1713_v21, %s2423_s6  ;;  %v1413_v21 = vrot.slane %v1411_v12, 5  ;;  %v1456_v39 = vor.u32 %v1455_v28, %v1451_v27 }
 0x140   : > { %1748 = vrot.lane.b32.xlu0 %v1710_v22, %s2423_s6  ;;  %1589 = vrot.lane.b32.xlu2 %v1558_v29, %s2422_s5 }
 0x141   : > { %v1305_v33 = vpop.permute.xlu1 %1304 }
 0x142   : > { %1340 = vst.msk [vmem:[#allocation2 + $0x34] sm:$0xf] %vm1326_vm13, %v1305_v33  ;;  %v1303_v38 = vpop.permute.xlu0 %1302  ;;  %v1753_v40 = vpop.permute.xlu2 %1752 }
 0x143   : > { %1339 = vst.msk [vmem:[#allocation2 + $0x30] sm:$0xf] %vm1326_vm13, %v1303_v38  ;;  %v2228_v38 = vld [vmem:[%s2483_s25 + $0x28] sm:$0xf] }
 0x144   : > { %1621 = vst.msk [vmem:[#allocation2 + $0x34] sm:$0xf] %vm1607_vm14, %v1586_v20  ;;  %v1409_v20 = vrot.slane %v1408_v11, 4  ;;  %v1681_v44 = vrot.slane %v2228_v38, 5 }
 0x146   : > { %v1414_v34 = vsel %vm2494_vm2, %v1409_v20, %v1413_v21  ;;  %v1683_v0 = vrot.slane %v1681_v44, 4 }
 0x147   : > { %1184 = vrot.lane.b32.xlu1 %v1134_v41, %s2420_s30  ;;  %v2191_v41 = vld [vmem:[%s2483_s25 + $0x40] sm:$0xf] }
 0x148   : > { %1758 = vrot.lane.b32.xlu0 %v1727_v43, %s2423_s6  ;;  %1756 = vrot.lane.b32.xlu2 %v1724_v37, %s2423_s6  ;;  %v2249_v43 = vrot.slane %v2227_v36, 9  ;;  %v1457_v37 = vrot.slane %v1456_v39, 4  ;;  %v1685_v4 = vsel %vm2562_vm5, %v1683_v0, %v1684_v1 }
 0x149   : > { %v1584_v49 = vpop.permute.xlu1 %1583 }
 0x14a   : > { %1620 = vst.msk [vmem:[#allocation2 + $0x30] sm:$0xf] %vm1607_vm14, %v1584_v49  ;;  %v1578_v52 = vpop.permute.xlu0 %1577  ;;  %v1183_v56 = vpop.permute.xlu2 %1182 }
 0x14b   : > { %1617 = vst.msk [vmem:[#allocation2 + $0x24] sm:$0xf] %vm1607_vm14, %v1578_v52  ;;  %v1682_v52 = vsel %vm2562_vm5, %v2249_v43, %v1681_v44 }
 0x14c   : > { %1789 = vst.msk [vmem:[#allocation2 + $0x30] sm:$0xf] %vm1776_vm15, %v1753_v40  ;;  %v1459_v40 = vshll.u32 %v2211_v24, 16 }
 0x14d   : > { %1230 = vst.msk [vmem:[#allocation2 + $0x4] sm:$0xf] %vm1228_vm11, %v1183_v56  ;;  %v2233_v56 = vld [vmem:[%s2483_s25 + $0x3c] sm:$0xe]  ;;  %s2103_s25 = sshll.u32 %s204_s24, 2 }
 0x14e   : > { %v1461_v46 = vrot.slane %v1459_v40, 5  ;;  %v2251_v62 = vrot.slane %v2233_v56, 9  ;;  %s3196_s26 = scalar_lea.vmem %s3266_s3, %s2103_s25 }
 0x14f   : > { %1194 = vrot.lane.b32.xlu1 %v1151_v57, %s2420_s30  ;;  %v1452_v57 = vsel %vm2494_vm2, %v1447_v50, %v1451_v27  ;;  %v3189_v50 = vld [vmem:[%s3265_s2] ss:$0 sm:$0xff] }
 0x150   : > { %1192 = vrot.lane.b32.xlu0 %v1148_v60, %s2420_s30  ;;  %1186 = vrot.lane.b32.xlu2 %v1137_v63, %s2420_s30  ;;  %v1462_v54 = vsel %vm2494_vm2, %v1457_v37, %v1461_v46  ;;  %v1698_v60 = vrot.slane %v2235_v55, 5  ;;  %v1696_v3 = vsel %vm2562_vm5, %v2251_v62, %v1695_v53 }
 0x151   : > { %v1747_v2 = vpop.permute.xlu1 %1746 }
 0x152   : > { %1786 = vst.msk [vmem:[#allocation2 + $0x24] sm:$0xf] %vm1776_vm15, %v1747_v2  ;;  %v1745_v6 = vpop.permute.xlu0 %1744  ;;  %v1279_v8 = vpop.permute.xlu2 %1278  ;;  %v1699_v2 = vsel %vm2562_vm5, %v1697_v59, %v1698_v60 }
 0x153   : > { %1785 = vst.msk [vmem:[#allocation2 + $0x20] sm:$0xf] %vm1776_vm15, %v1745_v6 }
 0x157   : > { %1290 = vrot.lane.b32.xlu1 %v2190_v10, %s2421_s4 }
 0x158   : > { %1284 = vrot.lane.b32.xlu0 %v2187_v13, %s2421_s4  ;;  %1282 = vrot.lane.b32.xlu2 %v2186_v17, %s2421_s4 }
 0x159   : > { %v1181_v22 = vpop.permute.xlu1 %1180 }
 0x15a   : > { %1229 = vst.msk [vmem:[#allocation2] sm:$0xf] %vm1228_vm11, %v1181_v22  ;;  %v1755_v29 = vpop.permute.xlu0 %1754  ;;  %v2310_v30 = vld [vmem:[#allocation2 + $0x20] sm:$0xff]  ;;  %v1289_v33 = vpop.permute.xlu2 %1288 }
 0x15b   : > { %1790 = vst.msk [vmem:[#allocation2 + $0x34] sm:$0xf] %vm1776_vm15, %v1755_v29  ;;  %2300 = vmatmul.msk.bf16.vlgmr.msra.gmra.mxu2 %vm1873_vm0, %v2310_v30 }
 0x15c   : > { %1327 = vst.msk [vmem:[#allocation2] sm:$0xf] %vm1326_vm13, %v1279_v8 }
 0x15f   : > { %1565 = vrot.lane.b32.xlu1 %v1414_v34, %s2422_s5 }
 0x160   : > { %1563 = vrot.lane.b32.xlu0 %v1404_v35, %s2422_s5  ;;  %1292 = vrot.lane.b32.xlu2 %v2191_v41, %s2421_s4 }
 0x161   : > { %v1191_v45 = vpop.permute.xlu1 %1190 }
 0x162   : > { %1234 = vst.msk [vmem:[#allocation2 + $0x14] sm:$0xf] %vm1228_vm11, %v1191_v45  ;;  %v1189_v48 = vpop.permute.xlu0 %1188  ;;  %v2312_v49 = vld [vmem:[#allocation2 + $0x30] sm:$0xff]  ;;  %v1568_v51 = vpop.permute.xlu2 %1567 }
 0x163   : > { %1233 = vst.msk [vmem:[#allocation2 + $0x10] sm:$0xf] %vm1228_vm11, %v1189_v48  ;;  %2302 = vmatmul.msk.bf16.vlgmr.msra.gmra.mxu3 %vm1873_vm0, %v2312_v49 }
 0x164   : > { %1332 = vst.msk [vmem:[#allocation2 + $0x14] sm:$0xf] %vm1326_vm13, %v1289_v33 }
 0x167   : > { %1732 = vrot.lane.b32.xlu1 %v1682_v52, %s2423_s6 }
 0x168   : > { %1573 = vrot.lane.b32.xlu0 %v1462_v54, %s2422_s5  ;;  %1571 = vrot.lane.b32.xlu2 %v1452_v57, %s2422_s5 }
 0x169   : > { %v1287_v61 = vpop.permute.xlu1 %1286 }
 0x16a   : > { %1331 = vst.msk [vmem:[#allocation2 + $0x10] sm:$0xf] %vm1326_vm13, %v1287_v61  ;;  %v1281_v63 = vpop.permute.xlu0 %1280  ;;  %v1731_v25 = vpop.permute.xlu2 %1730 }
 0x16b   : > { %1328 = vst.msk [vmem:[#allocation2 + $0x4] sm:$0xf] %vm1326_vm13, %v1281_v63 }
 0x16c   : > { %1612 = vst.msk [vmem:[#allocation2 + $0x10] sm:$0xf] %vm1607_vm14, %v1568_v51 }
 0x16f   : > { %1742 = vrot.lane.b32.xlu1 %v1699_v2, %s2423_s6 }
 0x170   : > { %1740 = vrot.lane.b32.xlu0 %v1696_v3, %s2423_s6  ;;  %1734 = vrot.lane.b32.xlu2 %v1685_v4, %s2423_s6 }
 0x171   : > { %v1562_v5 = vpop.permute.xlu1 %1561 }
 0x172   : > { %1609 = vst.msk [vmem:[#allocation2 + $0x4] sm:$0xf] %vm1607_vm14, %v1562_v5  ;;  %v1560_v6 = vpop.permute.xlu0 %1559  ;;  %v1032_v7 = vpop.permute.xlu2 %1031 }
 0x173   : > { %1608 = vst.msk [vmem:[#allocation2] sm:$0xf] %vm1607_vm14, %v1560_v6 }
 0x174   : > { %1778 = vst.msk [vmem:[#allocation2 + $0x4] sm:$0xf] %vm1776_vm15, %v1731_v25 }
 0x175   : > { %1070 = vst.msk [vmem:[#allocation2 + $0x28] sm:$0xf] %vm1059_vm10, %v1032_v7 }
 0x179   : > { %v1729_v8 = vpop.permute.xlu1 %1728 }
 0x17a   : > { %1777 = vst.msk [vmem:[#allocation2] sm:$0xf] %vm1776_vm15, %v1729_v8  ;;  %v1570_v26 = vpop.permute.xlu0 %1569  ;;  %v1042_v9 = vpop.permute.xlu2 %1041 }
 0x17b   : > { %1613 = vst.msk [vmem:[#allocation2 + $0x14] sm:$0xf] %vm1607_vm14, %v1570_v26 }
 0x17c   : > { %1075 = vst.msk [vmem:[#allocation2 + $0x3c] sm:$0xf] %vm1059_vm10, %v1042_v9 }
 0x181   : > { %v1739_v10 = vpop.permute.xlu1 %1738  ;;  %v2306_v11 = vld [vmem:[#allocation2] sm:$0xff] }
 0x182   : > { %1782 = vst.msk [vmem:[#allocation2 + $0x14] sm:$0xf] %vm1776_vm15, %v1739_v10  ;;  %v1737_v12 = vpop.permute.xlu0 %1736  ;;  %2296 = vmatmul.msk.bf16.vlgmr.msra.gmra.mxu0 %vm1873_vm0, %v2306_v11  ;;  %v1209_v13 = vpop.permute.xlu2 %1208 }
 0x183   : > { %1781 = vst.msk [vmem:[#allocation2 + $0x10] sm:$0xf] %vm1776_vm15, %v1737_v12 }
 0x189   : > { %v1040_v14 = vpop.permute.xlu1 %1039 }
 0x18a   : > { %1074 = vst.msk [vmem:[#allocation2 + $0x38] sm:$0xf] %vm1059_vm10, %v1040_v14  ;;  %v1034_v15 = vpop.permute.xlu0 %1033  ;;  %v2308_v16 = vld [vmem:[#allocation2 + $0x10] sm:$0xff]  ;;  %v1301_v17 = vpop.permute.xlu2 %1300 }
 0x18b   : > { %1071 = vst.msk [vmem:[#allocation2 + $0x2c] sm:$0xf] %vm1059_vm10, %v1034_v15  ;;  %2298 = vmatmul.msk.bf16.vlgmr.msra.gmra.mxu1 %vm1873_vm0, %v2308_v16 }
 0x18c   : > { %1243 = vst.msk [vmem:[#allocation2 + $0x38] sm:$0xf] %vm1228_vm11, %v1209_v13 }
 0x191   : > { %v1203_v18 = vpop.permute.xlu1 %1202 }
 0x192   : > { %1240 = vst.msk [vmem:[#allocation2 + $0x2c] sm:$0xf] %vm1228_vm11, %v1203_v18  ;;  %v1201_v19 = vpop.permute.xlu0 %1200  ;;  %v1580_v20 = vpop.permute.xlu2 %1579 }
 0x193   : > { %1239 = vst.msk [vmem:[#allocation2 + $0x28] sm:$0xf] %vm1228_vm11, %v1201_v19 }
 0x194   : > { %1338 = vst.msk [vmem:[#allocation2 + $0x2c] sm:$0xf] %vm1326_vm13, %v1301_v17 }
 0x199   : > { %v1299_v21 = vpop.permute.xlu1 %1298 }
 0x19a   : > { %1337 = vst.msk [vmem:[#allocation2 + $0x28] sm:$0xf] %vm1326_vm13, %v1299_v21  ;;  %v1211_v22 = vpop.permute.xlu0 %1210  ;;  %v1590_v23 = vpop.permute.xlu2 %1589 }
 0x19b   : > { %1244 = vst.msk [vmem:[#allocation2 + $0x3c] sm:$0xf] %vm1228_vm11, %v1211_v22 }
 0x19c   : > { %1618 = vst.msk [vmem:[#allocation2 + $0x28] sm:$0xf] %vm1607_vm14, %v1580_v20 }
 0x1a1   : > { %v1309_v24 = vpop.permute.xlu1 %1308 }
 0x1a2   : > { %1342 = vst.msk [vmem:[#allocation2 + $0x3c] sm:$0xf] %vm1326_vm13, %v1309_v24  ;;  %v1307_v27 = vpop.permute.xlu0 %1306  ;;  %v1757_v28 = vpop.permute.xlu2 %1756 }
 0x1a3   : > { %1341 = vst.msk [vmem:[#allocation2 + $0x38] sm:$0xf] %vm1326_vm13, %v1307_v27 }
 0x1a4   : > { %1623 = vst.msk [vmem:[#allocation2 + $0x3c] sm:$0xf] %vm1607_vm14, %v1590_v23 }
 0x1a9   : > { %v1588_v29 = vpop.permute.xlu1 %1587 }
 0x1aa   : > { %1622 = vst.msk [vmem:[#allocation2 + $0x38] sm:$0xf] %vm1607_vm14, %v1588_v29  ;;  %v1582_v30 = vpop.permute.xlu0 %1581  ;;  %v1187_v31 = vpop.permute.xlu2 %1186 }
 0x1ab   : > { %1619 = vst.msk [vmem:[#allocation2 + $0x2c] sm:$0xf] %vm1607_vm14, %v1582_v30 }
 0x1ac   : > { %1791 = vst.msk [vmem:[#allocation2 + $0x38] sm:$0xf] %vm1776_vm15, %v1757_v28 }
 0x1ad   : > { %1232 = vst.msk [vmem:[#allocation2 + $0xc] sm:$0xf] %vm1228_vm11, %v1187_v31 }
 0x1b1   : > { %v1751_v32 = vpop.permute.xlu1 %1750 }
 0x1b2   : > { %1788 = vst.msk [vmem:[#allocation2 + $0x2c] sm:$0xf] %vm1776_vm15, %v1751_v32  ;;  %v1749_v33 = vpop.permute.xlu0 %1748  ;;  %v1283_v34 = vpop.permute.xlu2 %1282 }
 0x1b3   : > { %1787 = vst.msk [vmem:[#allocation2 + $0x28] sm:$0xf] %vm1776_vm15, %v1749_v33 }
 0x1b9   : > { %v1185_v35 = vpop.permute.xlu1 %1184 }
 0x1ba   : > { %1231 = vst.msk [vmem:[#allocation2 + $0x8] sm:$0xf] %vm1228_vm11, %v1185_v35  ;;  %v1759_v36 = vpop.permute.xlu0 %1758  ;;  %v2311_v38 = vld [vmem:[#allocation2 + $0x28] sm:$0xff]  ;;  %v1293_v39 = vpop.permute.xlu2 %1292 }
 0x1bb   : > { %1792 = vst.msk [vmem:[#allocation2 + $0x3c] sm:$0xf] %vm1776_vm15, %v1759_v36  ;;  %2301 = vmatmul.msk.bf16.gmra.mxu2 %vm1873_vm0, %v2311_v38 }
 0x1bc   : > { %1329 = vst.msk [vmem:[#allocation2 + $0x8] sm:$0xf] %vm1326_vm13, %v1283_v34 }
 0x1c1   : > { %v1195_v40 = vpop.permute.xlu1 %1194 }
 0x1c2   : > { %1236 = vst.msk [vmem:[#allocation2 + $0x1c] sm:$0xf] %vm1228_vm11, %v1195_v40  ;;  %v1193_v41 = vpop.permute.xlu0 %1192  ;;  %v2313_v42 = vld [vmem:[#allocation2 + $0x38] sm:$0xff]  ;;  %v1572_v43 = vpop.permute.xlu2 %1571 }
 0x1c3   : > { %1235 = vst.msk [vmem:[#allocation2 + $0x18] sm:$0xf] %vm1228_vm11, %v1193_v41  ;;  %2303 = vmatmul.msk.bf16.gmra.mxu3 %vm1873_vm0, %v2313_v42 }
 0x1c4   : > { %1334 = vst.msk [vmem:[#allocation2 + $0x1c] sm:$0xf] %vm1326_vm13, %v1293_v39 }
 0x1c9   : > { %v1291_v44 = vpop.permute.xlu1 %1290 }
 0x1ca   : > { %1333 = vst.msk [vmem:[#allocation2 + $0x18] sm:$0xf] %vm1326_vm13, %v1291_v44  ;;  %v1285_v45 = vpop.permute.xlu0 %1284  ;;  %v1735_v46 = vpop.permute.xlu2 %1734 }
 0x1cb   : > { %1330 = vst.msk [vmem:[#allocation2 + $0xc] sm:$0xf] %vm1326_vm13, %v1285_v45 }
 0x1cc   : > { %1614 = vst.msk [vmem:[#allocation2 + $0x18] sm:$0xf] %vm1607_vm14, %v1572_v43 }
 0x1d1   : > { %v1566_v37 = vpop.permute.xlu1 %1565 }
 0x1d2   : > { %1611 = vst.msk [vmem:[#allocation2 + $0xc] sm:$0xf] %vm1607_vm14, %v1566_v37  ;;  %v1564_v47 = vpop.permute.xlu0 %1563 }
 0x1d3   : > { %1610 = vst.msk [vmem:[#allocation2 + $0x8] sm:$0xf] %vm1607_vm14, %v1564_v47 }
 0x1d4   : > { %1780 = vst.msk [vmem:[#allocation2 + $0xc] sm:$0xf] %vm1776_vm15, %v1735_v46 }
 0x1d9   : > { %v1733_v48 = vpop.permute.xlu1 %1732 }
 0x1da   : > { %1779 = vst.msk [vmem:[#allocation2 + $0x8] sm:$0xf] %vm1776_vm15, %v1733_v48  ;;  %v1574_v49 = vpop.permute.xlu0 %1573 }
 0x1db   : > { %1615 = vst.msk [vmem:[#allocation2 + $0x1c] sm:$0xf] %vm1607_vm14, %v1574_v49 }
 0x1de   : > { %v1931_v51 = vpop.f32.mrf.mxu2 }
 0x1df   : > { %v1932_v52 = vadd.f32 %v3189_v50, %v1931_v51 }
 0x1e1   : > { %v1743_v53 = vpop.permute.xlu1 %1742  ;;  %v2307_v54 = vld [vmem:[#allocation2 + $0x8] sm:$0xff]  ;;  %v1959_v55 = vmax.f32 %v1932_v52, 0.0 }
 0x1e2   : > { %1784 = vst.msk [vmem:[#allocation2 + $0x1c] sm:$0xf] %vm1776_vm15, %v1743_v53  ;;  %v1741_v56 = vpop.permute.xlu0 %1740  ;;  %2297 = vmatmul.msk.bf16.gmra.mxu0 %vm1873_vm0, %v2307_v54 }
 0x1e3   : > { %1783 = vst.msk [vmem:[#allocation2 + $0x18] sm:$0xf] %vm1776_vm15, %v1741_v56  ;;  %v1975_v57 = vpack.c.bf16 %v1959_v55, %v1959_v55 }
 0x1e5   : > { %1992 = vst.msk [vmem:[%s3196_s26 + $0x20] sm:$0xf] %vm1983_vm1, %v1975_v57 }
 0x1e6   : > { %v1933_v58 = vpop.f32.mrf.mxu2  ;;  %v1941_v59 = vpop.f32.mrf.mxu3 }
 0x1e7   : > { %v1934_v60 = vadd.f32 %v3189_v50, %v1933_v58  ;;  %v1942_v61 = vadd.f32 %v3189_v50, %v1941_v59 }
 0x1e9   : > { %v1960_v62 = vmax.f32 %v1934_v60, 0.0  ;;  %v1963_v63 = vmax.f32 %v1942_v61, 0.0 }
 0x1ea   : > { %v2309_v0 = vld [vmem:[#allocation2 + $0x18] sm:$0xff] }
 0x1eb   : > { %v1976_v1 = vpack.c.bf16 %v1960_v62, %v1960_v62  ;;  %v1979_v25 = vpack.c.bf16 %v1963_v63, %v1963_v63  ;;  %2299 = vmatmul.msk.bf16.gmra.mxu1 %vm1873_vm0, %v2309_v0 }
 0x1ed   : > { %1993 = vst.msk [vmem:[%s3196_s26 + $0x24] sm:$0xf] %vm1983_vm1, %v1976_v1 }
 0x1ee   : > { %1996 = vst.msk [vmem:[%s3196_s26 + $0x30] sm:$0xf] %vm1983_vm1, %v1979_v25  ;;  %v1943_v2 = vpop.f32.mrf.mxu3 }
 0x1ef   : > { %v1944_v3 = vadd.f32 %v3189_v50, %v1943_v2 }
 0x1f1   : > { %v1964_v4 = vmax.f32 %v1944_v3, 0.0 }
 0x1f3   : > { %v1980_v5 = vpack.c.bf16 %v1964_v4, %v1964_v4 }
 0x1f5   : > { %1997 = vst.msk [vmem:[%s3196_s26 + $0x34] sm:$0xf] %vm1983_vm1, %v1980_v5 }
 0x1ff   : > { %v1911_v6 = vpop.f32.mrf.mxu0 }
 0x200   : > { %v1912_v7 = vadd.f32 %v3189_v50, %v1911_v6 }
 0x202   : > { %v1951_v8 = vmax.f32 %v1912_v7, 0.0 }
 0x204   : > { %v1967_v26 = vpack.c.bf16 %v1951_v8, %v1951_v8 }
 0x206   : > { %1984 = vst.msk [vmem:[%s3196_s26] sm:$0xf] %vm1983_vm1, %v1967_v26 }
 0x207   : > { %v1913_v9 = vpop.f32.mrf.mxu0 }
 0x208   : > { %v1914_v10 = vadd.f32 %v3189_v50, %v1913_v9  ;;  %v1921_v11 = vpop.f32.mrf.mxu1 }
 0x209   : > { %v1922_v12 = vadd.f32 %v3189_v50, %v1921_v11 }
 0x20a   : > { %v1952_v13 = vmax.f32 %v1914_v10, 0.0 }
 0x20b   : > { %v1955_v14 = vmax.f32 %v1922_v12, 0.0 }
 0x20c   : > { %v1968_v15 = vpack.c.bf16 %v1952_v13, %v1952_v13 }
 0x20d   : > { %v1971_v16 = vpack.c.bf16 %v1955_v14, %v1955_v14 }
 0x20e   : > { %1985 = vst.msk [vmem:[%s3196_s26 + $0x4] sm:$0xf] %vm1983_vm1, %v1968_v15 }
 0x20f   : > { %1988 = vst.msk [vmem:[%s3196_s26 + $0x10] sm:$0xf] %vm1983_vm1, %v1971_v16 }
 0x210   : > { %v1923_v17 = vpop.f32.mrf.mxu1 }
 0x211   : > { %v1924_v18 = vadd.f32 %v3189_v50, %v1923_v17 }
 0x213   : > { %v1956_v19 = vmax.f32 %v1924_v18, 0.0 }
 0x215   : > { %v1972_v20 = vpack.c.bf16 %v1956_v19, %v1956_v19 }
 0x217   : > { %1989 = vst.msk [vmem:[%s3196_s26 + $0x14] sm:$0xf] %vm1983_vm1, %v1972_v20 }
 0x23e   : > { %v1936_v21 = vpop.f32.mrf.mxu2 }
 0x23f   : > { %v1937_v22 = vadd.f32 %v3189_v50, %v1936_v21 }
 0x241   : > { %v1961_v23 = vmax.f32 %v1937_v22, 0.0 }
 0x243   : > { %v1977_v24 = vpack.c.bf16 %v1961_v23, %v1961_v23 }
 0x245   : > { %1994 = vst.msk [vmem:[%s3196_s26 + $0x28] sm:$0xf] %vm1983_vm1, %v1977_v24 }
 0x246   : > { %v1938_v27 = vpop.f32.mrf.mxu2  ;;  %v1946_v28 = vpop.f32.mrf.mxu3 }
 0x247   : > { %v1939_v29 = vadd.f32 %v3189_v50, %v1938_v27  ;;  %v1947_v30 = vadd.f32 %v3189_v50, %v1946_v28 }
 0x249   : > { %v1962_v31 = vmax.f32 %v1939_v29, 0.0  ;;  %v1965_v32 = vmax.f32 %v1947_v30, 0.0 }
 0x24b   : > { %v1978_v33 = vpack.c.bf16 %v1962_v31, %v1962_v31  ;;  %v1981_v34 = vpack.c.bf16 %v1965_v32, %v1965_v32 }
 0x24d   : > { %1995 = vst.msk [vmem:[%s3196_s26 + $0x2c] sm:$0xf] %vm1983_vm1, %v1978_v33 }
 0x24e   : > { %1998 = vst.msk [vmem:[%s3196_s26 + $0x38] sm:$0xf] %vm1983_vm1, %v1981_v34  ;;  %v1948_v35 = vpop.f32.mrf.mxu3 }
 0x24f   : > { %v1949_v36 = vadd.f32 %v3189_v50, %v1948_v35 }
 0x251   : > { %v1966_v38 = vmax.f32 %v1949_v36, 0.0 }
 0x253   : > { %v1982_v39 = vpack.c.bf16 %v1966_v38, %v1966_v38 }
 0x255   : > { %1999 = vst.msk [vmem:[%s3196_s26 + $0x3c] sm:$0xf] %vm1983_vm1, %v1982_v39 }
 0x25f   : > { %v1916_v40 = vpop.f32.mrf.mxu0 }
 0x260   : > { %v1917_v41 = vadd.f32 %v3189_v50, %v1916_v40 }
 0x262   : > { %v1953_v42 = vmax.f32 %v1917_v41, 0.0 }
 0x264   : > { %v1969_v43 = vpack.c.bf16 %v1953_v42, %v1953_v42 }
 0x266   : > { %1986 = vst.msk [vmem:[%s3196_s26 + $0x8] sm:$0xf] %vm1983_vm1, %v1969_v43 }
 0x267   : > { %v1918_v44 = vpop.f32.mrf.mxu0 }
 0x268   : > { %v1919_v45 = vadd.f32 %v3189_v50, %v1918_v44  ;;  %v1926_v37 = vpop.f32.mrf.mxu1 }
 0x269   : > { %v1927_v46 = vadd.f32 %v3189_v50, %v1926_v37 }
 0x26a   : > { %v1954_v47 = vmax.f32 %v1919_v45, 0.0 }
 0x26b   : > { %v1957_v48 = vmax.f32 %v1927_v46, 0.0 }
 0x26c   : > { %v1970_v49 = vpack.c.bf16 %v1954_v47, %v1954_v47 }
 0x26d   : > { %v1973_v51 = vpack.c.bf16 %v1957_v48, %v1957_v48 }
 0x26e   : > { %1987 = vst.msk [vmem:[%s3196_s26 + $0xc] sm:$0xf] %vm1983_vm1, %v1970_v49 }
 0x26f   : > { %1990 = vst.msk [vmem:[%s3196_s26 + $0x18] sm:$0xf] %vm1983_vm1, %v1973_v51 }
 0x270   : > { %v1928_v52 = vpop.f32.mrf.mxu1 }
 0x271   : > { %v1929_v53 = vadd.f32 %v3189_v50, %v1928_v52 }
 0x273   : > { %v1958_v54 = vmax.f32 %v1929_v53, 0.0 }
 0x275   : > { %v1974_v55 = vpack.c.bf16 %v1958_v54, %v1958_v54 }
 0x277   : > { %1991 = vst.msk [vmem:[%s3196_s26 + $0x1c] sm:$0xf] %vm1983_vm1, %v1974_v55 }
 0x278 PF: > { %s13_s16 = sadd.s32 1, %s2414_s16   ;;  %s3271_s12 = smov %s2406_s14 }
 0x279   : > { %p10_p7 = scmp.ge.s32.totalorder %s13_s16, 6   ;;  %s3272_s13 = smov %s2410_s15 }
 0x27a   : > { %s3273_s14 = smov %s3276_s17  ;;  %s3274_s15 = smov %s3280_s18 }
 0x27b   :  { %12 = sbr.rel (!%p10_p7) target bundleno = 3 (0x3), region = 64 }

</bundles_post_ra>
